<compile_context>
chip_gen: v6e
topology: v6e:2x2x1
jax: 0.10.0
libtpu: 0.0.40
codegen_flags: <defaults>
</compile_context>

<pallas_src>
import jax
import jax.numpy as jnp
from jax.experimental import pallas as pl
from jax.experimental.pallas import tpu as pltpu

NUM_H1 = 256
NUM_H2 = 256
LANE = 128

TB_MAX = 512          # max rows per batch tile (sweepable: 512 / 1024)
MIN_GRID_SPLIT = 256  # batches above this get >= 2 (even) tiles for v7x megacore


def _round_up(x, m):
    return ((x + m - 1) // m) * m


def _cdiv(a, b):
    return -(-a // b)


# --------------------------------------------------------------------------- #
# Kernel
# --------------------------------------------------------------------------- #
def _actor_critic_kernel(x_ref,
                         w1_ref, b1_ref,
                         w2_ref, b2_ref,
                         w3_ref, b3_ref,
                         o_ref):
    """Fused policy+value MLP for one batch tile (3 MXU matmuls).

      h1 = relu(x  @ W1c  + b1c)      W1c  = [W1_policy | W1_value]   (S, 2*H1)
      h2 = relu(h1 @ W2bd + b2c)      W2bd = blockdiag(W2_p, W2_v)    (2*H1, 2*H2)
      o  =       h2 @ W3c  + b3c      W3c  cols[0:A]=policy, col[A]=value, rest 0

    Matmul inputs are in the weight dtype (bf16); accumulation is float32.
    The padded output slab is stored in o_ref's dtype (bf16).
    """
    cdt = w1_ref.dtype
    x = x_ref[...].astype(cdt)

    h1 = jnp.dot(x, w1_ref[...], preferred_element_type=jnp.float32) + b1_ref[...]
    h1 = jnp.maximum(h1, 0.0).astype(cdt)

    h2 = jnp.dot(h1, w2_ref[...], preferred_element_type=jnp.float32) + b2_ref[...]
    h2 = jnp.maximum(h2, 0.0).astype(cdt)

    out = jnp.dot(h2, w3_ref[...], preferred_element_type=jnp.float32) + b3_ref[...]
    o_ref[...] = out.astype(o_ref.dtype)


# --------------------------------------------------------------------------- #
# Wrapper
# --------------------------------------------------------------------------- #
def _choose_tiling(batch):
    """Return (tile_rows, padded_batch).

    Small batches -> one tile of round_up(B, 8) rows (no 128-padding).
    Large batches -> an even number of <=TB_MAX-row tiles so the 'parallel'
    grid axis splits evenly across v7x's two TensorCores.
    """
    if batch <= MIN_GRID_SPLIT:
        tb = max(8, _round_up(batch, 8))
        return tb, tb
    n_tiles = max(2, _cdiv(batch, TB_MAX))
    n_tiles += n_tiles % 2          # even grid => balanced megacore split
    tb = _round_up(_cdiv(batch, n_tiles), 8)
    return tb, n_tiles * tb


def _build_call(grid, tb, s, h1x2, h2x2, o_pad, single_buffer_weights):
    const = lambda i: (0, 0)
    if single_buffer_weights and hasattr(pl, "Buffered"):
        # Constant operands: block index never changes -> one buffer is enough.
        wspec = lambda shape: pl.BlockSpec(shape, const, pipeline_mode=pl.Buffered(1))
    else:
        wspec = lambda shape: pl.BlockSpec(shape, const)

    return pl.pallas_call(
        _actor_critic_kernel,
        out_shape=jax.ShapeDtypeStruct((grid * tb, o_pad), jnp.bfloat16),
        grid=(grid,),
        in_specs=[
            pl.BlockSpec((tb, s), lambda i: (i, 0)),   # x tile (double-buffered)
            wspec((s, h1x2)),                          # fused W1
            wspec((1, h1x2)),                          # fused b1
            wspec((h1x2, h2x2)),                       # block-diagonal W2
            wspec((1, h2x2)),                          # fused b2
            wspec((h2x2, o_pad)),                      # packed head W3
            wspec((1, o_pad)),                         # packed head b3
        ],
        out_specs=pl.BlockSpec((tb, o_pad), lambda i: (i, 0)),
        compiler_params=pltpu.CompilerParams(
            dimension_semantics=("parallel",)),
    )


def _fused_forward(params, x):
    """Run the fused actor-critic kernel; returns the (B, O_pad) bf16 slab."""
    B, S = x.shape
    h1x2 = params["w1c"].shape[1]
    h2x2 = params["w2bd"].shape[1]
    o_pad = params["w3c"].shape[1]

    tb, bp = _choose_tiling(B)
    if bp != B:
        x = jnp.pad(x, ((0, bp - B), (0, 0)))
    grid = bp // tb

    args = (x,
            params["w1c"], params["b1c"],
            params["w2bd"], params["b2c"],
            params["w3c"], params["b3c"])
    try:
        out = _build_call(grid, tb, S, h1x2, h2x2, o_pad, True)(*args)
    except Exception:
        # Fallback if this pallas_call path rejects pipeline_mode=Buffered(1).
        out = _build_call(grid, tb, S, h1x2, h2x2, o_pad, False)(*args)
    return out[:B]


def simulation_human_nn_forward(params, x):
    """Forward pass matching SimulationHumanNN.forward.

    Returns ((policy_mean, policy_scale), value):
      policy_mean  : (B, num_actions)  == Normal.loc
      policy_scale : (num_actions,)    == log_std.exp() (Normal.scale)
      value        : (B, 1)
    x may be f32 or bf16 (bf16 is passed straight through; f32 is cast in-kernel).
    """
    # TODO(synk): torch.distributions.Normal has no array equivalent; its (loc, scale)
    # parameters are returned instead of a distribution object.
    num_actions = params["log_std"].shape[0]
    out = _fused_forward(params, x)
    p_mean = out[:, :num_actions].astype(jnp.float32)
    v_out = out[:, num_actions:num_actions + 1].astype(jnp.float32)
    p_scale = jnp.exp(params["log_std"])
    return (p_mean, p_scale), v_out


# --------------------------------------------------------------------------- #
# Init (nn.Linear-style) + weight packing
# --------------------------------------------------------------------------- #
def _init_linear(key, fan_in, fan_out):
    """nn.Linear-style init, weight stored as (in, out) (transpose of PyTorch)."""
    kw, kb = jax.random.split(key)
    bound = 1.0 / (fan_in ** 0.5)
    w = jax.random.uniform(kw, (fan_in, fan_out), jnp.float32, -bound, bound)
    b = jax.random.uniform(kb, (1, fan_out), jnp.float32, -bound, bound)
    return w, b


def init_simulation_human_nn(key, num_states, num_actions,
                             num_h1=NUM_H1, num_h2=NUM_H2,
                             compute_dtype=jnp.bfloat16):
    keys = jax.random.split(key, 6)
    p_w1, p_b1 = _init_linear(keys[0], num_states, num_h1)
    p_w2, p_b2 = _init_linear(keys[1], num_h1, num_h2)
    p_w3, p_b3 = _init_linear(keys[2], num_h2, num_actions)
    v_w1, v_b1 = _init_linear(keys[3], num_states, num_h1)
    v_w2, v_b2 = _init_linear(keys[4], num_h1, num_h2)
    v_w3, v_b3 = _init_linear(keys[5], num_h2, 1)

    # Fused layer-1: (S, 2*H1); cols [0:H1] policy, [H1:2H1] value.
    w1c = jnp.concatenate([p_w1, v_w1], axis=1)
    b1c = jnp.concatenate([p_b1, v_b1], axis=1)

    # Block-diagonal layer-2: (2*H1, 2*H2) keeps the two trunks independent.
    w2bd = jnp.zeros((2 * num_h1, 2 * num_h2), jnp.float32)
    w2bd = w2bd.at[:num_h1, :num_h2].set(p_w2)
    w2bd = w2bd.at[num_h1:, num_h2:].set(v_w2)
    b2c = jnp.concatenate([p_b2, v_b2], axis=1)

    # Combined, zero-padded (lane-dense) head:
    #   rows [0:H2]   x cols [0:A] = policy W3;  rows [H2:2H2] x col [A] = value W3
    o_pad = max(LANE, _round_up(num_actions + 1, LANE))
    w3c = jnp.zeros((2 * num_h2, o_pad), jnp.float32)
    w3c = w3c.at[:num_h2, :num_actions].set(p_w3)
    w3c = w3c.at[num_h2:, num_actions:num_actions + 1].set(v_w3)
    b3c = jnp.zeros((1, o_pad), jnp.float32)
    b3c = b3c.at[:, :num_actions].set(p_b3)
    b3c = b3c.at[:, num_actions:num_actions + 1].set(v_b3)

    params = {
        # packed weights in the MXU compute dtype; biases kept f32 (1, H)
        "w1c": w1c.astype(compute_dtype), "b1c": b1c,
        "w2bd": w2bd.astype(compute_dtype), "b2c": b2c,
        "w3c": w3c.astype(compute_dtype), "b3c": b3c,
        # raw (unpacked) weights kept only for the pure-JAX reference
        "p_w1": p_w1.astype(compute_dtype), "p_b1": p_b1,
        "p_w2": p_w2.astype(compute_dtype), "p_b2": p_b2,
        "p_w3": p_w3.astype(compute_dtype), "p_b3": p_b3,
        "v_w1": v_w1.astype(compute_dtype), "v_b1": v_b1,
        "v_w2": v_w2.astype(compute_dtype), "v_b2": v_b2,
        "v_w3": v_w3.astype(compute_dtype), "v_b3": v_b3,
        "log_std": jnp.zeros((num_actions,), jnp.float32),
    }
    return params


# --------------------------------------------------------------------------- #
# Pure-JAX reference (mirrors bf16-matmul / f32-accumulate numerics)
# --------------------------------------------------------------------------- #
def _reference_forward(params, x):
    cdt = params["p_w1"].dtype
    xb = x.astype(cdt)

    def trunk(w1, b1, w2, b2):
        h = jnp.dot(xb, w1, preferred_element_type=jnp.float32) + b1
        h = jnp.maximum(h, 0.0).astype(cdt)
        h = jnp.dot(h, w2, preferred_element_type=jnp.float32) + b2
        return jnp.maximum(h, 0.0).astype(cdt)

    hp = trunk(params["p_w1"], params["p_b1"], params["p_w2"], params["p_b2"])
    hv = trunk(params["v_w1"], params["v_b1"], params["v_w2"], params["v_b2"])
    p = jnp.dot(hp, params["p_w3"], preferred_element_type=jnp.float32) + params["p_b3"]
    v = jnp.dot(hv, params["v_w3"], preferred_element_type=jnp.float32) + params["v_b3"]
    return p, jnp.exp(params["log_std"]), v


# --------------------------------------------------------------------------- #
# Self-test
# --------------------------------------------------------------------------- #
if __name__ == "__main__":
    # Small shapes consistent with the module (hidden sizes fixed at 256).
    batch = 8
    num_states = 32
    num_actions = 8

    key = jax.random.PRNGKey(0)
    k_param, k_x1, k_x2 = jax.random.split(key, 3)
    params = init_simulation_human_nn(k_param, num_states, num_actions)

    # Small-batch path: single tb = round_up(8, 8) = 8 tile, no 128-padding.
    x = jax.random.normal(k_x1, (batch, num_states), jnp.float32)
    (p_mean, p_scale), v_out = simulation_human_nn_forward(params, x)
    jax.block_until_ready((p_mean, p_scale, v_out))

    p_ref, s_ref, v_ref = _reference_forward(params, x)
    assert p_mean.shape == (batch, num_actions)
    assert p_scale.shape == (num_actions,)
    assert v_out.shape == (batch, 1)
    # Kernel emits a bf16 output slab -> compare at ~bf16 resolution.
    assert jnp.allclose(p_mean, p_ref, atol=1e-2, rtol=1e-2)
    assert jnp.allclose(p_scale, s_ref)
    assert jnp.allclose(v_out, v_ref, atol=1e-2, rtol=1e-2)

    # Larger, non-multiple batch: exercises the pad path and the even 2-tile
    # grid (balanced across v7x's two TensorCores; bigger tiles on v5e/v6e).
    x2 = jax.random.normal(k_x2, (300, num_states), jnp.float32)
    (p2, _), v2 = simulation_human_nn_forward(params, x2)
    jax.block_until_ready((p2, v2))
    p2_ref, _, v2_ref = _reference_forward(params, x2)
    assert p2.shape == (300, num_actions) and v2.shape == (300, 1)
    assert jnp.allclose(p2, p2_ref, atol=1e-2, rtol=1e-2)
    assert jnp.allclose(v2, v2_ref, atol=1e-2, rtol=1e-2)

    print("KERNEL_OK")
</pallas_src>

<mosaic_0001>
module attributes {stable_mosaic.version = 11 : i64} {
  func.func @_actor_critic_kernel(%arg0: i32, %arg1: memref<8x32xf32, #tpu.memory_space<vmem>>, %arg2: memref<32x512xbf16, #tpu.memory_space<vmem>>, %arg3: memref<1x512xf32, #tpu.memory_space<vmem>>, %arg4: memref<512x512xbf16, #tpu.memory_space<vmem>>, %arg5: memref<1x512xf32, #tpu.memory_space<vmem>>, %arg6: memref<512x128xbf16, #tpu.memory_space<vmem>>, %arg7: memref<1x128xf32, #tpu.memory_space<vmem>>, %arg8: memref<8x128xbf16, #tpu.memory_space<vmem>>) attributes {dimension_semantics = [#tpu.dimension_semantics<parallel>], iteration_bounds = array<i64: 1>, scalar_prefetch = 0 : i64, scratch_operands = 0 : i64, tpu.core_type = #tpu.core_type<tc>, window_params = [{transform_indices = @transform_0, window_bounds = array<i64: 8, 32>}, {pipeline_mode = #tpu.pipeline_mode<synchronous>, transform_indices = @transform_1, window_bounds = array<i64: 32, 512>}, {pipeline_mode = #tpu.pipeline_mode<synchronous>, transform_indices = @transform_2, window_bounds = array<i64: 1, 512>}, {pipeline_mode = #tpu.pipeline_mode<synchronous>, transform_indices = @transform_3, window_bounds = array<i64: 512, 512>}, {pipeline_mode = #tpu.pipeline_mode<synchronous>, transform_indices = @transform_4, window_bounds = array<i64: 1, 512>}, {pipeline_mode = #tpu.pipeline_mode<synchronous>, transform_indices = @transform_5, window_bounds = array<i64: 512, 128>}, {pipeline_mode = #tpu.pipeline_mode<synchronous>, transform_indices = @transform_6, window_bounds = array<i64: 1, 128>}, {transform_indices = @transform_7, window_bounds = array<i64: 8, 128>}]} {
    %c0 = arith.constant 0 : index
    %c0_0 = arith.constant 0 : index
    %0 = vector.load %arg1[%c0, %c0_0] : memref<8x32xf32, #tpu.memory_space<vmem>>, vector<8x32xf32>
    %1 = arith.truncf %0 : vector<8x32xf32> to vector<8x32xbf16>
    %c0_1 = arith.constant 0 : index
    %c0_2 = arith.constant 0 : index
    %2 = vector.load %arg2[%c0_1, %c0_2] : memref<32x512xbf16, #tpu.memory_space<vmem>>, vector<32x512xbf16>
    %cst = arith.constant dense<0.000000e+00> : vector<8x512xf32>
    %3 = tpu.matmul %1, %2, %cst {dimension_numbers = #tpu.dot_dimension_numbers<[1], [0], [0], [1], [0, 0, 1, 1], [], []>} : vector<8x32xbf16>, vector<32x512xbf16>, vector<8x512xf32> -> vector<8x512xf32>
    %c0_3 = arith.constant 0 : index
    %c0_4 = arith.constant 0 : index
    %4 = vector.load %arg3[%c0_3, %c0_4] : memref<1x512xf32, #tpu.memory_space<vmem>>, vector<1x512xf32>
    %5 = vector.broadcast %4 : vector<1x512xf32> to vector<8x512xf32>
    %6 = arith.addf %3, %5 : vector<8x512xf32>
    %cst_5 = arith.constant 0.000000e+00 : f32
    %7 = vector.broadcast %cst_5 : f32 to vector<8x512xf32>
    %8 = arith.maximumf %6, %7 : vector<8x512xf32>
    %9 = arith.truncf %8 : vector<8x512xf32> to vector<8x512xbf16>
    %c0_6 = arith.constant 0 : index
    %c0_7 = arith.constant 0 : index
    %10 = vector.load %arg4[%c0_6, %c0_7] : memref<512x512xbf16, #tpu.memory_space<vmem>>, vector<512x512xbf16>
    %cst_8 = arith.constant dense<0.000000e+00> : vector<8x512xf32>
    %11 = tpu.matmul %9, %10, %cst_8 {dimension_numbers = #tpu.dot_dimension_numbers<[1], [0], [0], [1], [0, 0, 1, 1], [], []>} : vector<8x512xbf16>, vector<512x512xbf16>, vector<8x512xf32> -> vector<8x512xf32>
    %c0_9 = arith.constant 0 : index
    %c0_10 = arith.constant 0 : index
    %12 = vector.load %arg5[%c0_9, %c0_10] : memref<1x512xf32, #tpu.memory_space<vmem>>, vector<1x512xf32>
    %13 = vector.broadcast %12 : vector<1x512xf32> to vector<8x512xf32>
    %14 = arith.addf %11, %13 : vector<8x512xf32>
    %cst_11 = arith.constant 0.000000e+00 : f32
    %15 = vector.broadcast %cst_11 : f32 to vector<8x512xf32>
    %16 = arith.maximumf %14, %15 : vector<8x512xf32>
    %17 = arith.truncf %16 : vector<8x512xf32> to vector<8x512xbf16>
    %c0_12 = arith.constant 0 : index
    %c0_13 = arith.constant 0 : index
    %18 = vector.load %arg6[%c0_12, %c0_13] : memref<512x128xbf16, #tpu.memory_space<vmem>>, vector<512x128xbf16>
    %cst_14 = arith.constant dense<0.000000e+00> : vector<8x128xf32>
    %19 = tpu.matmul %17, %18, %cst_14 {dimension_numbers = #tpu.dot_dimension_numbers<[1], [0], [0], [1], [0, 0, 1, 1], [], []>} : vector<8x512xbf16>, vector<512x128xbf16>, vector<8x128xf32> -> vector<8x128xf32>
    %c0_15 = arith.constant 0 : index
    %c0_16 = arith.constant 0 : index
    %20 = vector.load %arg7[%c0_15, %c0_16] : memref<1x128xf32, #tpu.memory_space<vmem>>, vector<1x128xf32>
    %21 = vector.broadcast %20 : vector<1x128xf32> to vector<8x128xf32>
    %22 = arith.addf %19, %21 : vector<8x128xf32>
    %23 = arith.truncf %22 : vector<8x128xf32> to vector<8x128xbf16>
    %c0_17 = arith.constant 0 : index
    %c0_18 = arith.constant 0 : index
    %24 = vector.load %arg8[%c0_17, %c0_18] : memref<8x128xbf16, #tpu.memory_space<vmem>>, vector<8x128xbf16>
    tpu.vector_store %arg8[%c0_17, %c0_18], %23 {strides = array<i32>} : memref<8x128xbf16, #tpu.memory_space<vmem>>, vector<8x128xbf16>,
    return
  }
  func.func @transform_0(%arg0: i32) -> (i32, i32) {
    %c0_i32 = arith.constant 0 : i32
    %c0_i32_0 = arith.constant 0 : i32
    return %arg0, %c0_i32 : i32, i32
  }
  func.func @transform_1(%arg0: i32) -> (i32, i32) {
    %c0_i32 = arith.constant 0 : i32
    %c0_i32_0 = arith.constant 0 : i32
    %c0_i32_1 = arith.constant 0 : i32
    return %c0_i32, %c0_i32_0 : i32, i32
  }
  func.func @transform_2(%arg0: i32) -> (i32, i32) {
    %c0_i32 = arith.constant 0 : i32
    %c0_i32_0 = arith.constant 0 : i32
    %c0_i32_1 = arith.constant 0 : i32
    return %c0_i32, %c0_i32_0 : i32, i32
  }
  func.func @transform_3(%arg0: i32) -> (i32, i32) {
    %c0_i32 = arith.constant 0 : i32
    %c0_i32_0 = arith.constant 0 : i32
    %c0_i32_1 = arith.constant 0 : i32
    return %c0_i32, %c0_i32_0 : i32, i32
  }
  func.func @transform_4(%arg0: i32) -> (i32, i32) {
    %c0_i32 = arith.constant 0 : i32
    %c0_i32_0 = arith.constant 0 : i32
    %c0_i32_1 = arith.constant 0 : i32
    return %c0_i32, %c0_i32_0 : i32, i32
  }
  func.func @transform_5(%arg0: i32) -> (i32, i32) {
    %c0_i32 = arith.constant 0 : i32
    %c0_i32_0 = arith.constant 0 : i32
    %c0_i32_1 = arith.constant 0 : i32
    return %c0_i32, %c0_i32_0 : i32, i32
  }
  func.func @transform_6(%arg0: i32) -> (i32, i32) {
    %c0_i32 = arith.constant 0 : i32
    %c0_i32_0 = arith.constant 0 : i32
    %c0_i32_1 = arith.constant 0 : i32
    return %c0_i32, %c0_i32_0 : i32, i32
  }
  func.func @transform_7(%arg0: i32) -> (i32, i32) {
    %c0_i32 = arith.constant 0 : i32
    %c0_i32_0 = arith.constant 0 : i32
    return %arg0, %c0_i32 : i32, i32
  }
}

module attributes {stable_mosaic.version = 11 : i64} {
  func.func @_actor_critic_kernel(%arg0: i32, %arg1: memref<8x32xf32, #tpu.memory_space<vmem>>, %arg2: memref<32x512xbf16, #tpu.memory_space<vmem>>, %arg3: memref<1x512xf32, #tpu.memory_space<vmem>>, %arg4: memref<512x512xbf16, #tpu.memory_space<vmem>>, %arg5: memref<1x512xf32, #tpu.memory_space<vmem>>, %arg6: memref<512x128xbf16, #tpu.memory_space<vmem>>, %arg7: memref<1x128xf32, #tpu.memory_space<vmem>>, %arg8: memref<8x128xbf16, #tpu.memory_space<vmem>>) attributes {dimension_semantics = [#tpu.dimension_semantics<parallel>], iteration_bounds = array<i64: 1>, scalar_prefetch = 0 : i64, scratch_operands = 0 : i64, tpu.core_type = #tpu.core_type<tc>, window_params = [{transform_indices = @transform_0, window_bounds = array<i64: 8, 32>}, {pipeline_mode = #tpu.pipeline_mode<synchronous>, transform_indices = @transform_1, window_bounds = array<i64: 32, 512>}, {pipeline_mode = #tpu.pipeline_mode<synchronous>, transform_indices = @transform_2, window_bounds = array<i64: 1, 512>}, {pipeline_mode = #tpu.pipeline_mode<synchronous>, transform_indices = @transform_3, window_bounds = array<i64: 512, 512>}, {pipeline_mode = #tpu.pipeline_mode<synchronous>, transform_indices = @transform_4, window_bounds = array<i64: 1, 512>}, {pipeline_mode = #tpu.pipeline_mode<synchronous>, transform_indices = @transform_5, window_bounds = array<i64: 512, 128>}, {pipeline_mode = #tpu.pipeline_mode<synchronous>, transform_indices = @transform_6, window_bounds = array<i64: 1, 128>}, {transform_indices = @transform_7, window_bounds = array<i64: 8, 128>}]} {
    %c0 = arith.constant 0 : index
    %c0_0 = arith.constant 0 : index
    %0 = vector.load %arg1[%c0, %c0_0] : memref<8x32xf32, #tpu.memory_space<vmem>>, vector<8x32xf32>
    %1 = arith.truncf %0 : vector<8x32xf32> to vector<8x32xbf16>
    %c0_1 = arith.constant 0 : index
    %c0_2 = arith.constant 0 : index
    %2 = vector.load %arg2[%c0_1, %c0_2] : memref<32x512xbf16, #tpu.memory_space<vmem>>, vector<32x512xbf16>
    %cst = arith.constant dense<0.000000e+00> : vector<8x512xf32>
    %3 = tpu.matmul %1, %2, %cst {dimension_numbers = #tpu.dot_dimension_numbers<[1], [0], [0], [1], [0, 0, 1, 1], [], []>} : vector<8x32xbf16>, vector<32x512xbf16>, vector<8x512xf32> -> vector<8x512xf32>
    %c0_3 = arith.constant 0 : index
    %c0_4 = arith.constant 0 : index
    %4 = vector.load %arg3[%c0_3, %c0_4] : memref<1x512xf32, #tpu.memory_space<vmem>>, vector<1x512xf32>
    %5 = vector.broadcast %4 : vector<1x512xf32> to vector<8x512xf32>
    %6 = arith.addf %3, %5 : vector<8x512xf32>
    %cst_5 = arith.constant 0.000000e+00 : f32
    %7 = vector.broadcast %cst_5 : f32 to vector<8x512xf32>
    %8 = arith.maximumf %6, %7 : vector<8x512xf32>
    %9 = arith.truncf %8 : vector<8x512xf32> to vector<8x512xbf16>
    %c0_6 = arith.constant 0 : index
    %c0_7 = arith.constant 0 : index
    %10 = vector.load %arg4[%c0_6, %c0_7] : memref<512x512xbf16, #tpu.memory_space<vmem>>, vector<512x512xbf16>
    %cst_8 = arith.constant dense<0.000000e+00> : vector<8x512xf32>
    %11 = tpu.matmul %9, %10, %cst_8 {dimension_numbers = #tpu.dot_dimension_numbers<[1], [0], [0], [1], [0, 0, 1, 1], [], []>} : vector<8x512xbf16>, vector<512x512xbf16>, vector<8x512xf32> -> vector<8x512xf32>
    %c0_9 = arith.constant 0 : index
    %c0_10 = arith.constant 0 : index
    %12 = vector.load %arg5[%c0_9, %c0_10] : memref<1x512xf32, #tpu.memory_space<vmem>>, vector<1x512xf32>
    %13 = vector.broadcast %12 : vector<1x512xf32> to vector<8x512xf32>
    %14 = arith.addf %11, %13 : vector<8x512xf32>
    %cst_11 = arith.constant 0.000000e+00 : f32
    %15 = vector.broadcast %cst_11 : f32 to vector<8x512xf32>
    %16 = arith.maximumf %14, %15 : vector<8x512xf32>
    %17 = arith.truncf %16 : vector<8x512xf32> to vector<8x512xbf16>
    %c0_12 = arith.constant 0 : index
    %c0_13 = arith.constant 0 : index
    %18 = vector.load %arg6[%c0_12, %c0_13] : memref<512x128xbf16, #tpu.memory_space<vmem>>, vector<512x128xbf16>
    %cst_14 = arith.constant dense<0.000000e+00> : vector<8x128xf32>
    %19 = tpu.matmul %17, %18, %cst_14 {dimension_numbers = #tpu.dot_dimension_numbers<[1], [0], [0], [1], [0, 0, 1, 1], [], []>} : vector<8x512xbf16>, vector<512x128xbf16>, vector<8x128xf32> -> vector<8x128xf32>
    %c0_15 = arith.constant 0 : index
    %c0_16 = arith.constant 0 : index
    %20 = vector.load %arg7[%c0_15, %c0_16] : memref<1x128xf32, #tpu.memory_space<vmem>>, vector<1x128xf32>
    %21 = vector.broadcast %20 : vector<1x128xf32> to vector<8x128xf32>
    %22 = arith.addf %19, %21 : vector<8x128xf32>
    %23 = arith.truncf %22 : vector<8x128xf32> to vector<8x128xbf16>
    %c0_17 = arith.constant 0 : index
    %c0_18 = arith.constant 0 : index
    %24 = vector.load %arg8[%c0_17, %c0_18] : memref<8x128xbf16, #tpu.memory_space<vmem>>, vector<8x128xbf16>
    tpu.vector_store %arg8[%c0_17, %c0_18], %23 {strides = array<i32>} : memref<8x128xbf16, #tpu.memory_space<vmem>>, vector<8x128xbf16>,
    return
  }
  func.func @transform_0(%arg0: i32) -> (i32, i32) {
    %c0_i32 = arith.constant 0 : i32
    %c0_i32_0 = arith.constant 0 : i32
    return %arg0, %c0_i32 : i32, i32
  }
  func.func @transform_1(%arg0: i32) -> (i32, i32) {
    %c0_i32 = arith.constant 0 : i32
    %c0_i32_0 = arith.constant 0 : i32
    %c0_i32_1 = arith.constant 0 : i32
    return %c0_i32, %c0_i32_0 : i32, i32
  }
  func.func @transform_2(%arg0: i32) -> (i32, i32) {
    %c0_i32 = arith.constant 0 : i32
    %c0_i32_0 = arith.constant 0 : i32
    %c0_i32_1 = arith.constant 0 : i32
    return %c0_i32, %c0_i32_0 : i32, i32
  }
  func.func @transform_3(%arg0: i32) -> (i32, i32) {
    %c0_i32 = arith.constant 0 : i32
    %c0_i32_0 = arith.constant 0 : i32
    %c0_i32_1 = arith.constant 0 : i32
    return %c0_i32, %c0_i32_0 : i32, i32
  }
  func.func @transform_4(%arg0: i32) -> (i32, i32) {
    %c0_i32 = arith.constant 0 : i32
    %c0_i32_0 = arith.constant 0 : i32
    %c0_i32_1 = arith.constant 0 : i32
    return %c0_i32, %c0_i32_0 : i32, i32
  }
  func.func @transform_5(%arg0: i32) -> (i32, i32) {
    %c0_i32 = arith.constant 0 : i32
    %c0_i32_0 = arith.constant 0 : i32
    %c0_i32_1 = arith.constant 0 : i32
    return %c0_i32, %c0_i32_0 : i32, i32
  }
  func.func @transform_6(%arg0: i32) -> (i32, i32) {
    %c0_i32 = arith.constant 0 : i32
    %c0_i32_0 = arith.constant 0 : i32
    %c0_i32_1 = arith.constant 0 : i32
    return %c0_i32, %c0_i32_0 : i32, i32
  }
  func.func @transform_7(%arg0: i32) -> (i32, i32) {
    %c0_i32 = arith.constant 0 : i32
    %c0_i32_0 = arith.constant 0 : i32
    return %arg0, %c0_i32 : i32, i32
  }
}

</mosaic_0001>

<bundles_post_ra>
// kernel: tpu_custom_call.1
= control target key start
LH: loop header
LB: loop body
LE: loop exit
PB: predicated region body
PF: predicated region fallthrough
CT: control target
= control target key end

     0   :  { %12 = vsyncpa [#allocation3], 0  ;;  %s2277_s0 = inlined_call_operand.hbm [shape: f32[8,32], index: 0, kind: input, shape index: {}]   ;;  %s2278_s1 = inlined_call_operand.hbm [shape: bf16[32,512], index: 1, kind: input, shape index: {}]   ;;  %s2279_s2 = inlined_call_operand.hbm [shape: f32[1,512], index: 2, kind: input, shape index: {}]   ;;  %s2280_s3 = inlined_call_operand.hbm [shape: bf16[512,512], index: 3, kind: input, shape index: {}]   ;;  %s2281_s4 = inlined_call_operand.vmem [shape: f32[1,512], index: 4, kind: input, shape index: {}]   ;;  %s2282_s5 = inlined_call_operand.hbm [shape: bf16[512,128], index: 5, kind: input, shape index: {}]   ;;  %s2283_s6 = inlined_call_operand.vmem [shape: f32[1,128], index: 6, kind: input, shape index: {}]   ;;  %s2284_s7 = inlined_call_operand.hbm [shape: bf16[8,128], index: 7, kind: output, shape index: {}]  }
   0x1   :  { %13 = vsyncpa [#allocation6], 0 }
   0x2   :  { %14 = vsyncpa [#allocation9], 0 }
   0x3   :  { %15 = vsyncpa [#allocation4], 0  ;;  %s2172_s24 = smov [#allocation5]  }
   0x4   :  { %s31_s25 = sshll.u32 %s2172_s24, 4  ;;  %s32_s25 = int_to_ptr.vmem [resolvable:$true] %s31_s25 }
   0x5   :  { %s2052_s26 = scalar_lea.vmem %s32_s25, 1024  ;;  %p2057_p1 = scmp.lt.s32.totalorder %s32_s25, %s32_s25 }
   0x6   :  { %p2053_p0 = scmp.ne.s32.totalorder %s32_s25, %s2052_s26  ;;  %p2058_p2 = scmp.lt.s32.totalorder %s2052_s26, %s2052_s26 }
   0x8   :  { %p2059_p3 = por %p2058_p2, %p2057_p1 }
   0xa   :  { %p2060_p4 = pnand %p2059_p3, %p2053_p0 }
   0xc   :  { %2063 = shalt.err (!%p2060_p4)
}
   0xd   :  { %s2173_s27 = smov 256   ;;  %s2174_s28 = smov 16  }
   0xe   :  { %37 = dma.hbm_to_vmem [thread:$0]  %s2278_s1, 1024, %s32_s25, [#allocation6], %s2173_s27, %s2173_s27, %s2174_s28  }
   0xf   :  { %s2175_s8 = smov [#allocation8]   ;;  %s2176_s10 = smov [#allocation2]  }
  0x10   :  { %s53_s9 = sshll.u32 %s2175_s8, 4  ;;  %s22_s11 = sshll.u32 %s2176_s10, 4  ;;  %s54_s9 = int_to_ptr.vmem [resolvable:$true] %s53_s9  ;;  %s23_s11 = int_to_ptr.vmem [resolvable:$true] %s22_s11 }
  0x11   :  { %s2072_s12 = scalar_lea.vmem %s54_s9, 16384  ;;  %p2077_p6 = scmp.lt.s32.totalorder %s54_s9, %s54_s9 }
  0x12   :  { %p2073_p5 = scmp.ne.s32.totalorder %s54_s9, %s2072_s12  ;;  %p2078_p7 = scmp.lt.s32.totalorder %s2072_s12, %s2072_s12 }
  0x14   :  { %p2079_p8 = por %p2078_p7, %p2077_p6 }
  0x16   :  { %p2080_p9 = pnand %p2079_p8, %p2073_p5 }
  0x18   :  { %2083 = shalt.err (!%p2080_p9)
}
  0x19   :  { %59 = dma.hbm_to_vmem [thread:$0]  %s2280_s3, 16384, %s54_s9, [#allocation9], %s2173_s27, %s2173_s27, %s2174_s28  }
  0x1a   :  { %s2092_s15 = scalar_lea.vmem %s23_s11, 128  ;;  %p2097_p11 = scmp.lt.s32.totalorder %s23_s11, %s23_s11 }
  0x1b   :  { %p2093_p10 = scmp.ne.s32.totalorder %s23_s11, %s2092_s15  ;;  %p2098_p12 = scmp.lt.s32.totalorder %s2092_s15, %s2092_s15 }
  0x1d   :  { %p2099_p13 = por %p2098_p12, %p2097_p11 }
  0x1f   :  { %p2100_p0 = pnand %p2099_p13, %p2093_p10 }
  0x21   :  { %2103 = shalt.err (!%p2100_p0)
}
  0x22   :  { %25 = dma.hbm_to_vmem [thread:$0]  %s2277_s0, 128, %s23_s11, [#allocation3]  }
  0x23   :  { %s2177_s17 = smov [#allocation7]   ;;  %s2178_s19 = smov [#allocation10]  }
  0x24   :  { %s44_s18 = sshll.u32 %s2177_s17, 4  ;;  %s67_s20 = sshll.u32 %s2178_s19, 4  ;;  %s45_s18 = int_to_ptr.vmem [resolvable:$true] %s44_s18  ;;  %s68_s20 = int_to_ptr.vmem [resolvable:$true] %s67_s20 }
  0x25   :  { %s2112_s21 = scalar_lea.vmem %s45_s18, 64  ;;  %p2117_p2 = scmp.lt.s32.totalorder %s45_s18, %s45_s18 }
  0x26   :  { %p2113_p1 = scmp.ne.s32.totalorder %s45_s18, %s2112_s21  ;;  %p2118_p3 = scmp.lt.s32.totalorder %s2112_s21, %s2112_s21 }
  0x28   :  { %p2119_p4 = por %p2118_p3, %p2117_p2 }
  0x2a   :  { %p2120_p5 = pnand %p2119_p4, %p2113_p1 }
  0x2c   :  { %2123 = shalt.err (!%p2120_p5)
}
  0x2d   :  { %47 = dma.hbm_to_vmem [thread:$0]  %s2279_s2, 64, %s45_s18, [#allocation6]  }
  0x2e   :  { %s2132_s23 = scalar_lea.vmem %s68_s20, 4096  ;;  %p2137_p7 = scmp.lt.s32.totalorder %s68_s20, %s68_s20 }
  0x2f   :  { %p2133_p6 = scmp.ne.s32.totalorder %s68_s20, %s2132_s23  ;;  %p2138_p8 = scmp.lt.s32.totalorder %s2132_s23, %s2132_s23 }
  0x31   :  { %p2139_p9 = por %p2138_p8, %p2137_p7 }
  0x33   :  { %p2140_p10 = pnand %p2139_p9, %p2133_p6 }
  0x35   :  { %2143 = shalt.err (!%p2140_p10)
}
  0x36   :  { %s2179_s0 = smov 64   ;;  %s2180_s24 = smov 4  }
  0x37   :  { %73 = dma.hbm_to_vmem [thread:$0]  %s2282_s5, 4096, %s68_s20, [#allocation9], %s2179_s0, %s2179_s0, %s2180_s24  }
  0x38   :  { %2164 = dma.done.wait [#allocation3], 128  }
  0x39   :  { %2165 = vsyncadd [#allocation3], 4294967168 }
  0x3a   :  { %2166 = dma.done.wait [#allocation6], 1088  }
  0x3b   :  { %2167 = vsyncadd [#allocation6], 4294966208 }
  0x3c   :  { %2168 = dma.done.wait [#allocation9], 20480  }
  0x3d   :  { %2169 = vsyncadd [#allocation9], 4294946816  ;;  %v2181_v0 = vmov 0   ;;  %v1808_v1 = vld [vmem:[#allocation5 + $0x24] ss:$16 sps:$4 sm:$0xff]   ;;  %v92_v9 = vld [vmem:[#allocation2] sm:$0xff] }
  0x3e   :  { %200 = vmatprep.mubr.bf16.mxu0 %v2181_v0  ;;  %241 = vmatprep.mubr.bf16.mxu1 %v2181_v0  ;;  %v1810_v2 = vld [vmem:[#allocation5 + $0x2c] ss:$16 sps:$4 sm:$0xff]   ;;  %v1812_v3 = vld [vmem:[#allocation5 + $0x20] ss:$16 sps:$4 sm:$0xff]   ;;  %v1813_v4 = vld [vmem:[#allocation5 + $0x28] ss:$16 sps:$4 sm:$0xff]   ;;  %v93_v12 = vpack.c.bf16 %v92_v9, %v92_v9 }
  0x3f   :  { %180 = vmatprep.subr.bf16.mxu0 %v1808_v1  ;;  %221 = vmatprep.subr.bf16.mxu1 %v1810_v2  ;;  %v1814_v5 = vld [vmem:[#allocation5 + $0x4] ss:$16 sps:$4 sm:$0xff]   ;;  %v1816_v6 = vld [vmem:[#allocation5 + $0xc] ss:$16 sps:$4 sm:$0xff]   ;;  %v1818_v7 = vld [vmem:[#allocation5] ss:$16 sps:$4 sm:$0xff]  }
  0x40   :  { %181 = vmatpush1.bf16.msra.mxu0 %v1812_v3  ;;  %222 = vmatpush1.bf16.msra.mxu1 %v1813_v4  ;;  %v1819_v8 = vld [vmem:[#allocation5 + $0x8] ss:$16 sps:$4 sm:$0xff]   ;;  %v1820_v10 = vld [vmem:[#allocation8 + $0xe0] ss:$16 sps:$4 sm:$0xff]   ;;  %vm164_vm0 = vcmask 261120   ;;  %s2182_s28 = smov [#allocation11]  }
  0x41   :  { %182 = vmatprep.subr.bf16.mxu0 %v1814_v5  ;;  %223 = vmatprep.subr.bf16.mxu1 %v1816_v6  ;;  %v1822_v11 = vld [vmem:[#allocation8 + $0xe4] ss:$16 sps:$4 sm:$0xff]   ;;  %v1823_v13 = vld [vmem:[#allocation8 + $0x2e0] ss:$16 sps:$4 sm:$0xff]   ;;  %s1571_s29 = sshll.u32 %s2182_s28, 4  ;;  %s1572_s29 = int_to_ptr.vmem [resolvable:$true] %s1571_s29 }
  0x42   :  { %v1825_v14 = vld [vmem:[#allocation8 + $0x2e4] ss:$16 sps:$4 sm:$0xff]   ;;  %v1826_v17 = vld [vmem:[#allocation8 + $0xc0] ss:$16 sps:$4 sm:$0xff]   ;;  %s2144_s30 = scalar_lea.vmem %s1572_s29, 64  ;;  %p2149_p12 = scmp.lt.s32.totalorder %s1572_s29, %s1572_s29 }
  0x43   :  { %v1828_v15 = vld [vmem:[#allocation8 + $0xc4] ss:$16 sps:$4 sm:$0xff]   ;;  %v1829_v18 = vld [vmem:[#allocation8 + $0x2c0] ss:$16 sps:$4 sm:$0xff]   ;;  %p2145_p11 = scmp.ne.s32.totalorder %s1572_s29, %s2144_s30  ;;  %p2150_p13 = scmp.lt.s32.totalorder %s2144_s30, %s2144_s30 }
  0x44   :  { %183 = vmatpush1.bf16.msra.mxu0 %v1818_v7  ;;  %224 = vmatpush1.bf16.msra.mxu1 %v1819_v8  ;;  %v1831_v16 = vld [vmem:[#allocation8 + $0x2c4] ss:$16 sps:$4 sm:$0xff]   ;;  %v1832_v21 = vld [vmem:[#allocation8 + $0xa0] ss:$16 sps:$4 sm:$0xff]  }
  0x45   :  { %1048 = vmatprep.subr.bf16.mxu0 %v1822_v11  ;;  %1089 = vmatprep.subr.bf16.mxu1 %v1825_v14  ;;  %v1834_v19 = vld [vmem:[#allocation8 + $0xa4] ss:$16 sps:$4 sm:$0xff]   ;;  %v1835_v22 = vld [vmem:[#allocation8 + $0x2a0] ss:$16 sps:$4 sm:$0xff]   ;;  %v1918_v11 = vld [vmem:[#allocation8 + $0xec] ss:$16 sps:$4 sm:$0xff]   ;;  %p2151_p0 = por %p2150_p13, %p2149_p12 }
  0x46   :  { %v1837_v20 = vld [vmem:[#allocation8 + $0x2a4] ss:$16 sps:$4 sm:$0xff]   ;;  %v1838_v25 = vld [vmem:[#allocation8 + $0x80] ss:$16 sps:$4 sm:$0xff]  }
  0x47   :  { %1590 = vmatmul.mubr.msk.bf16.vlgmr.msra.gmra.mxu0 %vm164_vm0, %v93_v12  ;;  %1591 = vmatmul.mubr.msk.bf16.vlgmr.msra.gmra.mxu1 %vm164_vm0, %v93_v12  ;;  %v1840_v23 = vld [vmem:[#allocation8 + $0x84] ss:$16 sps:$4 sm:$0xff]   ;;  %v1841_v26 = vld [vmem:[#allocation8 + $0x280] ss:$16 sps:$4 sm:$0xff]   ;;  %v1921_v12 = vld [vmem:[#allocation8 + $0x2ec] ss:$16 sps:$4 sm:$0xff]   ;;  %p2152_p1 = pnand %p2151_p0, %p2145_p11 }
  0x48   :  { %1049 = vmatpush1.bf16.msra.mxu0 %v1820_v10  ;;  %1090 = vmatpush1.bf16.msra.mxu1 %v1823_v13  ;;  %v1843_v24 = vld [vmem:[#allocation8 + $0x284] ss:$16 sps:$4 sm:$0xff]   ;;  %v1844_v29 = vld [vmem:[#allocation8 + $0x60] ss:$16 sps:$4 sm:$0xff]   ;;  %v104_v13 = vlaneseq }
  0x49   :  { %1050 = vmatprep.subr.bf16.mxu0 %v1828_v15  ;;  %1091 = vmatprep.subr.bf16.mxu1 %v1831_v16  ;;  %v1846_v27 = vld [vmem:[#allocation8 + $0x64] ss:$16 sps:$4 sm:$0xff]   ;;  %v1847_v30 = vld [vmem:[#allocation8 + $0x260] ss:$16 sps:$4 sm:$0xff]  }
  0x4a   :  { %v1849_v28 = vld [vmem:[#allocation8 + $0x264] ss:$16 sps:$4 sm:$0xff]   ;;  %v1850_v33 = vld [vmem:[#allocation8 + $0x40] ss:$16 sps:$4 sm:$0xff]   ;;  %v2238_v14 = vshrl.u32 %v104_v13, 7 }
  0x4b   :  { %v1852_v31 = vld [vmem:[#allocation8 + $0x44] ss:$16 sps:$4 sm:$0xff]   ;;  %v1853_v34 = vld [vmem:[#allocation8 + $0x240] ss:$16 sps:$4 sm:$0xff]   ;;  %v1967_v13 = vld [vmem:[#allocation8 + $0x3e8] ss:$16 sps:$4 sm:$0xff]  }
  0x4c   :  { %1051 = vmatpush1.bf16.msra.mxu0 %v1826_v17  ;;  %1092 = vmatpush1.bf16.msra.mxu1 %v1829_v18  ;;  %v1855_v32 = vld [vmem:[#allocation8 + $0x244] ss:$16 sps:$4 sm:$0xff]   ;;  %v1856_v37 = vld [vmem:[#allocation8 + $0x20] ss:$16 sps:$4 sm:$0xff]   ;;  %v106_v15 = vsub.s32 0, %v2238_v14  ;;  %v114_v16 = vsub.s32 2, %v2238_v14 }
  0x4d   :  { %1052 = vmatprep.subr.bf16.mxu0 %v1834_v19  ;;  %1093 = vmatprep.subr.bf16.mxu1 %v1837_v20  ;;  %v1858_v35 = vld [vmem:[#allocation8 + $0x24] ss:$16 sps:$4 sm:$0xff]   ;;  %v1859_v38 = vld [vmem:[#allocation8 + $0x220] ss:$16 sps:$4 sm:$0xff]   ;;  %v102_v17 = vld [vmem:[#allocation7] sm:$0xf] }
  0x4e   :  { %v1861_v36 = vld [vmem:[#allocation8 + $0x224] ss:$16 sps:$4 sm:$0xff]   ;;  %v1862_v41 = vld [vmem:[#allocation8] ss:$16 sps:$4 sm:$0xff]   ;;  %v110_v18 = vsub.s32 1, %v2238_v14  ;;  %v118_v19 = vsub.s32 3, %v2238_v14  ;;  %v107_v20 = vrot.slane %v102_v17, %v106_v15 }
  0x4f   :  { %v1864_v39 = vld [vmem:[#allocation8 + $0x4] ss:$16 sps:$4 sm:$0xff]   ;;  %v1865_v42 = vld [vmem:[#allocation8 + $0x200] ss:$16 sps:$4 sm:$0xff]  }
  0x50   :  { %1053 = vmatpush1.bf16.msra.mxu0 %v1832_v21  ;;  %1094 = vmatpush1.bf16.msra.mxu1 %v1835_v22  ;;  %v1867_v40 = vld [vmem:[#allocation8 + $0x204] ss:$16 sps:$4 sm:$0xff]   ;;  %v1868_v45 = vld [vmem:[#allocation8 + $0x1e0] ss:$16 sps:$4 sm:$0xff]   ;;  %v115_v21 = vrot.slane %v102_v17, %v114_v16  ;;  %v111_v22 = vrot.slane %v102_v17, %v110_v18 }
  0x51   :  { %1054 = vmatprep.subr.bf16.mxu0 %v1840_v23  ;;  %1095 = vmatprep.subr.bf16.mxu1 %v1843_v24  ;;  %v1870_v43 = vld [vmem:[#allocation8 + $0x1e4] ss:$16 sps:$4 sm:$0xff]   ;;  %v1871_v46 = vld [vmem:[#allocation8 + $0x3e0] ss:$16 sps:$4 sm:$0xff]   ;;  %v119_v23 = vrot.slane %v102_v17, %v118_v19  ;;  %v1972_v17 = vld [vmem:[#allocation8 + $0x1cc] ss:$16 sps:$4 sm:$0xff]  }
  0x52   :  { %v1873_v44 = vld [vmem:[#allocation8 + $0x3e4] ss:$16 sps:$4 sm:$0xff]   ;;  %v1874_v49 = vld [vmem:[#allocation8 + $0x1c0] ss:$16 sps:$4 sm:$0xff]  }
  0x53   :  { %v1876_v47 = vld [vmem:[#allocation8 + $0x1c4] ss:$16 sps:$4 sm:$0xff]   ;;  %v1877_v50 = vld [vmem:[#allocation8 + $0x3c0] ss:$16 sps:$4 sm:$0xff]  }
  0x54   :  { %1055 = vmatpush1.bf16.msra.mxu0 %v1838_v25  ;;  %1096 = vmatpush1.bf16.msra.mxu1 %v1841_v26  ;;  %v1879_v48 = vld [vmem:[#allocation8 + $0x3c4] ss:$16 sps:$4 sm:$0xff]   ;;  %v1880_v53 = vld [vmem:[#allocation8 + $0x1a0] ss:$16 sps:$4 sm:$0xff]  }
  0x55   :  { %1056 = vmatprep.subr.bf16.mxu0 %v1846_v27  ;;  %1097 = vmatprep.subr.bf16.mxu1 %v1849_v28  ;;  %v1882_v51 = vld [vmem:[#allocation8 + $0x1a4] ss:$16 sps:$4 sm:$0xff]   ;;  %v1883_v54 = vld [vmem:[#allocation8 + $0x3a0] ss:$16 sps:$4 sm:$0xff]  }
  0x56   :  { %v1885_v52 = vld [vmem:[#allocation8 + $0x3a4] ss:$16 sps:$4 sm:$0xff]   ;;  %v1886_v57 = vld [vmem:[#allocation8 + $0x180] ss:$16 sps:$4 sm:$0xff]  }
  0x57   :  { %v1888_v55 = vld [vmem:[#allocation8 + $0x184] ss:$16 sps:$4 sm:$0xff]   ;;  %v1889_v58 = vld [vmem:[#allocation8 + $0x380] ss:$16 sps:$4 sm:$0xff]  }
  0x58   :  { %1057 = vmatpush1.bf16.msra.mxu0 %v1844_v29  ;;  %1098 = vmatpush1.bf16.msra.mxu1 %v1847_v30  ;;  %v1891_v56 = vld [vmem:[#allocation8 + $0x384] ss:$16 sps:$4 sm:$0xff]   ;;  %v1892_v61 = vld [vmem:[#allocation8 + $0x160] ss:$16 sps:$4 sm:$0xff]  }
  0x59   :  { %1058 = vmatprep.subr.bf16.mxu0 %v1852_v31  ;;  %1099 = vmatprep.subr.bf16.mxu1 %v1855_v32  ;;  %v1894_v59 = vld [vmem:[#allocation8 + $0x164] ss:$16 sps:$4 sm:$0xff]   ;;  %v1895_v62 = vld [vmem:[#allocation8 + $0x360] ss:$16 sps:$4 sm:$0xff]  }
  0x5a   :  { %v1897_v60 = vld [vmem:[#allocation8 + $0x364] ss:$16 sps:$4 sm:$0xff]   ;;  %v1898_v1 = vld [vmem:[#allocation8 + $0x140] ss:$16 sps:$4 sm:$0xff]  }
  0x5b   :  { %v1900_v63 = vld [vmem:[#allocation8 + $0x144] ss:$16 sps:$4 sm:$0xff]   ;;  %v1901_v2 = vld [vmem:[#allocation8 + $0x340] ss:$16 sps:$4 sm:$0xff]  }
  0x5c   :  { %1059 = vmatpush1.bf16.msra.mxu0 %v1850_v33  ;;  %1100 = vmatpush1.bf16.msra.mxu1 %v1853_v34  ;;  %v1903_v0 = vld [vmem:[#allocation8 + $0x344] ss:$16 sps:$4 sm:$0xff]   ;;  %v1904_v5 = vld [vmem:[#allocation8 + $0x120] ss:$16 sps:$4 sm:$0xff]  }
  0x5d   :  { %1060 = vmatprep.subr.bf16.mxu0 %v1858_v35  ;;  %1101 = vmatprep.subr.bf16.mxu1 %v1861_v36  ;;  %v1906_v3 = vld [vmem:[#allocation8 + $0x124] ss:$16 sps:$4 sm:$0xff]   ;;  %v1907_v6 = vld [vmem:[#allocation8 + $0x320] ss:$16 sps:$4 sm:$0xff]  }
  0x5e   :  { %v1909_v4 = vld [vmem:[#allocation8 + $0x324] ss:$16 sps:$4 sm:$0xff]   ;;  %v1910_v9 = vld [vmem:[#allocation8 + $0x100] ss:$16 sps:$4 sm:$0xff]  }
  0x5f   :  { %v1912_v7 = vld [vmem:[#allocation8 + $0x104] ss:$16 sps:$4 sm:$0xff]   ;;  %v1913_v10 = vld [vmem:[#allocation8 + $0x300] ss:$16 sps:$4 sm:$0xff]  }
  0x60   :  { %1061 = vmatpush1.bf16.msra.mxu0 %v1856_v37  ;;  %1102 = vmatpush1.bf16.msra.mxu1 %v1859_v38  ;;  %v1915_v8 = vld [vmem:[#allocation8 + $0x304] ss:$16 sps:$4 sm:$0xff]  }
  0x61   :  { %1062 = vmatprep.subr.bf16.mxu0 %v1864_v39  ;;  %1103 = vmatprep.subr.bf16.mxu1 %v1867_v40 }
  0x64   :  { %1063 = vmatpush1.bf16.msra.mxu0 %v1862_v41  ;;  %1104 = vmatpush1.bf16.msra.mxu1 %v1865_v42 }
  0x65   :  { %1064 = vmatprep.subr.bf16.mxu0 %v1870_v43  ;;  %1105 = vmatprep.subr.bf16.mxu1 %v1873_v44  ;;  %v1916_v43 = vld [vmem:[#allocation8 + $0xe8] ss:$16 sps:$4 sm:$0xff]  }
  0x66   :  { %v1919_v44 = vld [vmem:[#allocation8 + $0x2e8] ss:$16 sps:$4 sm:$0xff]  }
  0x68   :  { %1065 = vmatpush2.bf16.msra.mxu0 %v1868_v45  ;;  %1106 = vmatpush2.bf16.msra.mxu1 %v1871_v46  ;;  %v1924_v46 = vld [vmem:[#allocation8 + $0xcc] ss:$16 sps:$4 sm:$0xff]  }
  0x69   :  { %1066 = vmatprep.subr.bf16.mxu0 %v1876_v47  ;;  %1107 = vmatprep.subr.bf16.mxu1 %v1879_v48  ;;  %v1927_v47 = vld [vmem:[#allocation8 + $0x2cc] ss:$16 sps:$4 sm:$0xff]   ;;  %v1922_v48 = vld [vmem:[#allocation8 + $0xc8] ss:$16 sps:$4 sm:$0xff]  }
  0x6c   :  { %1067 = vmatpush2.bf16.msra.mxu0 %v1874_v49  ;;  %1108 = vmatpush2.bf16.msra.mxu1 %v1877_v50  ;;  %v1925_v49 = vld [vmem:[#allocation8 + $0x2c8] ss:$16 sps:$4 sm:$0xff]   ;;  %v1930_v50 = vld [vmem:[#allocation8 + $0xac] ss:$16 sps:$4 sm:$0xff]  }
  0x6d   :  { %1068 = vmatprep.subr.bf16.mxu0 %v1882_v51  ;;  %1109 = vmatprep.subr.bf16.mxu1 %v1885_v52  ;;  %v1933_v51 = vld [vmem:[#allocation8 + $0x2ac] ss:$16 sps:$4 sm:$0xff]   ;;  %v1928_v52 = vld [vmem:[#allocation8 + $0xa8] ss:$16 sps:$4 sm:$0xff]  }
  0x70   :  { %1069 = vmatpush2.bf16.msra.mxu0 %v1880_v53  ;;  %1110 = vmatpush2.bf16.msra.mxu1 %v1883_v54  ;;  %v1931_v53 = vld [vmem:[#allocation8 + $0x2a8] ss:$16 sps:$4 sm:$0xff]   ;;  %v1936_v54 = vld [vmem:[#allocation8 + $0x8c] ss:$16 sps:$4 sm:$0xff]  }
  0x71   :  { %1070 = vmatprep.subr.bf16.mxu0 %v1888_v55  ;;  %1111 = vmatprep.subr.bf16.mxu1 %v1891_v56  ;;  %v1939_v55 = vld [vmem:[#allocation8 + $0x28c] ss:$16 sps:$4 sm:$0xff]   ;;  %v1934_v56 = vld [vmem:[#allocation8 + $0x88] ss:$16 sps:$4 sm:$0xff]  }
  0x74   :  { %1071 = vmatpush2.bf16.msra.mxu0 %v1886_v57  ;;  %1112 = vmatpush2.bf16.msra.mxu1 %v1889_v58  ;;  %v1937_v57 = vld [vmem:[#allocation8 + $0x288] ss:$16 sps:$4 sm:$0xff]   ;;  %v1942_v58 = vld [vmem:[#allocation8 + $0x6c] ss:$16 sps:$4 sm:$0xff]  }
  0x75   :  { %1072 = vmatprep.subr.bf16.mxu0 %v1894_v59  ;;  %1113 = vmatprep.subr.bf16.mxu1 %v1897_v60  ;;  %v1945_v59 = vld [vmem:[#allocation8 + $0x26c] ss:$16 sps:$4 sm:$0xff]   ;;  %v1940_v60 = vld [vmem:[#allocation8 + $0x68] ss:$16 sps:$4 sm:$0xff]  }
  0x78   :  { %1073 = vmatpush2.bf16.msra.mxu0 %v1892_v61  ;;  %1114 = vmatpush2.bf16.msra.mxu1 %v1895_v62  ;;  %v1943_v61 = vld [vmem:[#allocation8 + $0x268] ss:$16 sps:$4 sm:$0xff]   ;;  %v1948_v62 = vld [vmem:[#allocation8 + $0x4c] ss:$16 sps:$4 sm:$0xff]  }
  0x79   :  { %1074 = vmatprep.subr.bf16.mxu0 %v1900_v63  ;;  %1115 = vmatprep.subr.bf16.mxu1 %v1903_v0  ;;  %v1951_v63 = vld [vmem:[#allocation8 + $0x24c] ss:$16 sps:$4 sm:$0xff]   ;;  %v1946_v0 = vld [vmem:[#allocation8 + $0x48] ss:$16 sps:$4 sm:$0xff]  }
  0x7c   :  { %1075 = vmatpush2.bf16.msra.mxu0 %v1898_v1  ;;  %1116 = vmatpush2.bf16.msra.mxu1 %v1901_v2  ;;  %v1949_v1 = vld [vmem:[#allocation8 + $0x248] ss:$16 sps:$4 sm:$0xff]   ;;  %v1954_v2 = vld [vmem:[#allocation8 + $0x2c] ss:$16 sps:$4 sm:$0xff]  }
  0x7d   :  { %1076 = vmatprep.subr.bf16.mxu0 %v1906_v3  ;;  %1117 = vmatprep.subr.bf16.mxu1 %v1909_v4  ;;  %v1957_v3 = vld [vmem:[#allocation8 + $0x22c] ss:$16 sps:$4 sm:$0xff]   ;;  %v1952_v4 = vld [vmem:[#allocation8 + $0x28] ss:$16 sps:$4 sm:$0xff]  }
  0x80   :  { %1077 = vmatpush2.bf16.msra.mxu0 %v1904_v5  ;;  %1118 = vmatpush2.bf16.msra.mxu1 %v1907_v6  ;;  %v1955_v5 = vld [vmem:[#allocation8 + $0x228] ss:$16 sps:$4 sm:$0xff]   ;;  %v1960_v6 = vld [vmem:[#allocation8 + $0xc] ss:$16 sps:$4 sm:$0xff]  }
  0x81   :  { %1078 = vmatprep.subr.bf16.mxu0 %v1912_v7  ;;  %1119 = vmatprep.subr.bf16.mxu1 %v1915_v8  ;;  %v1963_v7 = vld [vmem:[#allocation8 + $0x20c] ss:$16 sps:$4 sm:$0xff]   ;;  %v1958_v8 = vld [vmem:[#allocation8 + $0x8] ss:$16 sps:$4 sm:$0xff]  }
  0x84   :  { %1079 = vmatpush2.bf16.msra.mxu0 %v1910_v9  ;;  %1120 = vmatpush2.bf16.msra.mxu1 %v1913_v10  ;;  %v1961_v9 = vld [vmem:[#allocation8 + $0x208] ss:$16 sps:$4 sm:$0xff]   ;;  %v1966_v10 = vld [vmem:[#allocation8 + $0x1ec] ss:$16 sps:$4 sm:$0xff]  }
  0x85   :  { %1130 = vmatprep.subr.bf16.mxu0 %v1918_v11  ;;  %1171 = vmatprep.subr.bf16.mxu1 %v1921_v12  ;;  %v1969_v11 = vld [vmem:[#allocation8 + $0x3ec] ss:$16 sps:$4 sm:$0xff]   ;;  %v1964_v12 = vld [vmem:[#allocation8 + $0x1e8] ss:$16 sps:$4 sm:$0xff]  }
 0x107   :  { %v202_v24 = vpop.f32.mrf.mxu0  ;;  %v243_v25 = vpop.f32.mrf.mxu1 }
 0x108   :  { %v203_v26 = vadd.f32 %v202_v24, %v107_v20  ;;  %v244_v27 = vadd.f32 %v243_v25, %v115_v21  ;;  %v1975_v20 = vld [vmem:[#allocation8 + $0x3cc] ss:$16 sps:$4 sm:$0xff]   ;;  %v1970_v21 = vld [vmem:[#allocation8 + $0x1c8] ss:$16 sps:$4 sm:$0xff]  }
 0x109   :  { %v204_v28 = vpop.f32.mrf.mxu0  ;;  %v245_v29 = vpop.f32.mrf.mxu1  ;;  %v1981_v24 = vld [vmem:[#allocation8 + $0x3ac] ss:$16 sps:$4 sm:$0xff]   ;;  %v1976_v25 = vld [vmem:[#allocation8 + $0x1a8] ss:$16 sps:$4 sm:$0xff]  }
 0x10a   :  { %v252_v30 = vmax.f32 %v244_v27, 0.0  ;;  %v205_v31 = vadd.f32 %v204_v28, %v111_v22  ;;  %v246_v32 = vadd.f32 %v245_v29, %v119_v23  ;;  %v250_v33 = vmax.f32 %v203_v26, 0.0  ;;  %v1973_v22 = vld [vmem:[#allocation8 + $0x3c8] ss:$16 sps:$4 sm:$0xff]   ;;  %v1978_v23 = vld [vmem:[#allocation8 + $0x1ac] ss:$16 sps:$4 sm:$0xff]  }
 0x10b   :  { %v206_v34 = vpop.f32.mrf.mxu0  ;;  %v247_v35 = vpop.f32.mrf.mxu1  ;;  %v1979_v26 = vld [vmem:[#allocation8 + $0x3a8] ss:$16 sps:$4 sm:$0xff]   ;;  %v1984_v27 = vld [vmem:[#allocation8 + $0x18c] ss:$16 sps:$4 sm:$0xff]  }
 0x10c   :  { %v251_v36 = vmax.f32 %v205_v31, 0.0  ;;  %v253_v37 = vmax.f32 %v246_v32, 0.0  ;;  %v2252_v38 = vpack.c.bf16 %v252_v30, %v252_v30  ;;  %v2254_v45 = vpack.c.bf16 %v250_v33, %v250_v33  ;;  %v1987_v28 = vld [vmem:[#allocation8 + $0x38c] ss:$16 sps:$4 sm:$0xff]   ;;  %v1982_v29 = vld [vmem:[#allocation8 + $0x188] ss:$16 sps:$4 sm:$0xff]  }
 0x10d   :  { %v207_v39 = vpop.f32.mrf.mxu0  ;;  %v248_v40 = vpop.f32.mrf.mxu1  ;;  %v1985_v30 = vld [vmem:[#allocation8 + $0x388] ss:$16 sps:$4 sm:$0xff]   ;;  %v1990_v31 = vld [vmem:[#allocation8 + $0x16c] ss:$16 sps:$4 sm:$0xff]  }
 0x10e   :  { %v255_v41 = vpack.c.bf16 %v251_v36, %v251_v36  ;;  %v257_v42 = vpack.c.bf16 %v253_v37, %v253_v37  ;;  %v1993_v32 = vld [vmem:[#allocation8 + $0x36c] ss:$16 sps:$4 sm:$0xff]   ;;  %v1988_v33 = vld [vmem:[#allocation8 + $0x168] ss:$16 sps:$4 sm:$0xff]  }
 0x10f   :  { %v1991_v34 = vld [vmem:[#allocation8 + $0x368] ss:$16 sps:$4 sm:$0xff]   ;;  %v1996_v35 = vld [vmem:[#allocation8 + $0x14c] ss:$16 sps:$4 sm:$0xff]  }
 0x110   :  { %1080 = vmatprep.mubr.bf16.mxu0 %v255_v41  ;;  %1121 = vmatprep.mubr.bf16.mxu1 %v257_v42  ;;  %v1999_v36 = vld [vmem:[#allocation8 + $0x34c] ss:$16 sps:$4 sm:$0xff]   ;;  %v1994_v37 = vld [vmem:[#allocation8 + $0x148] ss:$16 sps:$4 sm:$0xff]  }
 0x111   :  { %1081 = vmatmul.mubr.bf16.vlgmr.msra.gmra.mxu0 %v2254_v45  ;;  %1122 = vmatmul.mubr.bf16.vlgmr.msra.gmra.mxu1 %v2252_v38  ;;  %v1997_v39 = vld [vmem:[#allocation8 + $0x348] ss:$16 sps:$4 sm:$0xff]   ;;  %v2002_v40 = vld [vmem:[#allocation8 + $0x12c] ss:$16 sps:$4 sm:$0xff]  }
 0x112   :  { %1131 = vmatpush1.bf16.msra.mxu0 %v1916_v43  ;;  %1172 = vmatpush1.bf16.msra.mxu1 %v1919_v44  ;;  %v2003_v43 = vld [vmem:[#allocation8 + $0x328] ss:$16 sps:$4 sm:$0xff]   ;;  %v2008_v44 = vld [vmem:[#allocation8 + $0x10c] ss:$16 sps:$4 sm:$0xff]  }
 0x113   :  { %1162 = vmatprep.mubr.bf16.mxu0 %v255_v41  ;;  %1203 = vmatprep.mubr.bf16.mxu1 %v257_v42  ;;  %v2005_v41 = vld [vmem:[#allocation8 + $0x32c] ss:$16 sps:$4 sm:$0xff]   ;;  %v2000_v42 = vld [vmem:[#allocation8 + $0x128] ss:$16 sps:$4 sm:$0xff]  }
 0x114   :  { %1132 = vmatprep.subr.bf16.mxu0 %v1924_v46  ;;  %1173 = vmatprep.subr.bf16.mxu1 %v1927_v47  ;;  %v2011_v46 = vld [vmem:[#allocation8 + $0x30c] ss:$16 sps:$4 sm:$0xff]   ;;  %v2006_v47 = vld [vmem:[#allocation8 + $0x108] ss:$16 sps:$4 sm:$0xff]  }
 0x116   :  { %1133 = vmatpush1.bf16.msra.mxu0 %v1922_v48  ;;  %1174 = vmatpush1.bf16.msra.mxu1 %v1925_v49  ;;  %v2009_v48 = vld [vmem:[#allocation8 + $0x308] ss:$16 sps:$4 sm:$0xff]  }
 0x117   :  { %1134 = vmatprep.subr.bf16.mxu0 %v1930_v50  ;;  %1175 = vmatprep.subr.bf16.mxu1 %v1933_v51  ;;  %v2012_v49 = vld [vmem:[#allocation10 + $0x78] sm:$0xff]   ;;  %v2014_v51 = vld [vmem:[#allocation10 + $0x70] sm:$0xff]  }
 0x118   :  { %v2013_v50 = vld [vmem:[#allocation10 + $0x38] sm:$0xff]  }
 0x11a   :  { %1135 = vmatpush1.bf16.msra.mxu0 %v1928_v52  ;;  %1176 = vmatpush1.bf16.msra.mxu1 %v1931_v53  ;;  %v2015_v52 = vld [vmem:[#allocation10 + $0x30] sm:$0xff]   ;;  %v2016_v53 = vld [vmem:[#allocation10 + $0x68] sm:$0xff]  }
 0x11b   :  { %1136 = vmatprep.subr.bf16.mxu0 %v1936_v54  ;;  %1177 = vmatprep.subr.bf16.mxu1 %v1939_v55  ;;  %v2017_v54 = vld [vmem:[#allocation10 + $0x28] sm:$0xff]   ;;  %v2018_v55 = vld [vmem:[#allocation10 + $0x60] sm:$0xff]  }
 0x11e   :  { %1137 = vmatpush1.bf16.msra.mxu0 %v1934_v56  ;;  %1178 = vmatpush1.bf16.msra.mxu1 %v1937_v57  ;;  %v2019_v56 = vld [vmem:[#allocation10 + $0x20] sm:$0xff]   ;;  %v2020_v57 = vld [vmem:[#allocation10 + $0x58] sm:$0xff]  }
 0x11f   :  { %1138 = vmatprep.subr.bf16.mxu0 %v1942_v58  ;;  %1179 = vmatprep.subr.bf16.mxu1 %v1945_v59  ;;  %v2028_v58 = vld [vmem:[#allocation10 + $0xf8] sm:$0xff]  }
 0x120   :  { %v2029_v59 = vld [vmem:[#allocation10 + $0xb8] sm:$0xff]  }
 0x122   :  { %1139 = vmatpush1.bf16.msra.mxu0 %v1940_v60  ;;  %1180 = vmatpush1.bf16.msra.mxu1 %v1943_v61  ;;  %v2030_v60 = vld [vmem:[#allocation10 + $0xf0] sm:$0xff]   ;;  %v2021_v61 = vld [vmem:[#allocation10 + $0x18] sm:$0xff]  }
 0x123   :  { %1140 = vmatprep.subr.bf16.mxu0 %v1948_v62  ;;  %1181 = vmatprep.subr.bf16.mxu1 %v1951_v63  ;;  %v2032_v62 = vld [vmem:[#allocation10 + $0xe8] sm:$0xff]   ;;  %v2023_v63 = vld [vmem:[#allocation10 + $0x10] sm:$0xff]  }
 0x126   :  { %1141 = vmatpush1.bf16.msra.mxu0 %v1946_v0  ;;  %1182 = vmatpush1.bf16.msra.mxu1 %v1949_v1  ;;  %v2024_v0 = vld [vmem:[#allocation10 + $0x48] sm:$0xff]  }
 0x127   :  { %1142 = vmatprep.subr.bf16.mxu0 %v1954_v2  ;;  %1183 = vmatprep.subr.bf16.mxu1 %v1957_v3  ;;  %v2033_v1 = vld [vmem:[#allocation10 + $0xa8] sm:$0xff]   ;;  %v2034_v2 = vld [vmem:[#allocation10 + $0xe0] sm:$0xff]  }
 0x128   :  { %v2025_v3 = vld [vmem:[#allocation10 + $0x8] sm:$0xff]  }
 0x12a   :  { %1143 = vmatpush1.bf16.msra.mxu0 %v1952_v4  ;;  %1184 = vmatpush1.bf16.msra.mxu1 %v1955_v5  ;;  %v2026_v4 = vld [vmem:[#allocation10 + $0x40] sm:$0xff]  }
 0x12b   :  { %1144 = vmatprep.subr.bf16.mxu0 %v1960_v6  ;;  %1185 = vmatprep.subr.bf16.mxu1 %v1963_v7  ;;  %v2035_v5 = vld [vmem:[#allocation10 + $0xa0] sm:$0xff]   ;;  %v2036_v6 = vld [vmem:[#allocation10 + $0xd8] sm:$0xff]  }
 0x12c   :  { %v2027_v7 = vld [vmem:[#allocation10] sm:$0xff]  }
 0x12e   :  { %1145 = vmatpush1.bf16.msra.mxu0 %v1958_v8  ;;  %1186 = vmatpush1.bf16.msra.mxu1 %v1961_v9  ;;  %v2037_v8 = vld [vmem:[#allocation10 + $0x98] sm:$0xff]   ;;  %v2038_v9 = vld [vmem:[#allocation10 + $0xd0] sm:$0xff]  }
 0x12f   :  { %1146 = vmatprep.subr.bf16.mxu0 %v1966_v10  ;;  %1187 = vmatprep.subr.bf16.mxu1 %v1969_v11  ;;  %v2039_v10 = vld [vmem:[#allocation10 + $0x90] sm:$0xff]   ;;  %v2040_v11 = vld [vmem:[#allocation10 + $0xc8] sm:$0xff]  }
 0x132   :  { %1147 = vmatpush2.bf16.msra.mxu0 %v1964_v12  ;;  %1188 = vmatpush2.bf16.msra.mxu1 %v1967_v13  ;;  %v2041_v12 = vld [vmem:[#allocation10 + $0x88] sm:$0xff]   ;;  %v2042_v13 = vld [vmem:[#allocation10 + $0xc0] sm:$0xff]  }
 0x133   :  { %1148 = vmatprep.subr.bf16.mxu0 %v1972_v17  ;;  %1189 = vmatprep.subr.bf16.mxu1 %v1975_v20  ;;  %v2043_v17 = vld [vmem:[#allocation10 + $0x80] sm:$0xff]   ;;  %v386_v20 = vld [vmem:[%s2281_s4] sm:$0xf] }
 0x136   :  { %1149 = vmatpush2.bf16.msra.mxu0 %v1970_v21  ;;  %1190 = vmatpush2.bf16.msra.mxu1 %v1973_v22  ;;  %v391_v21 = vrot.slane %v386_v20, %v106_v15  ;;  %v395_v22 = vrot.slane %v386_v20, %v110_v18  ;;  %v399_v15 = vrot.slane %v386_v20, %v114_v16 }
 0x137   :  { %1150 = vmatprep.subr.bf16.mxu0 %v1978_v23  ;;  %1191 = vmatprep.subr.bf16.mxu1 %v1981_v24  ;;  %v403_v18 = vrot.slane %v386_v20, %v118_v19 }
 0x13a   :  { %1151 = vmatpush2.bf16.msra.mxu0 %v1976_v25  ;;  %1192 = vmatpush2.bf16.msra.mxu1 %v1979_v26 }
 0x13b   :  { %1152 = vmatprep.subr.bf16.mxu0 %v1984_v27  ;;  %1193 = vmatprep.subr.bf16.mxu1 %v1987_v28 }
 0x13e   :  { %1153 = vmatpush2.bf16.msra.mxu0 %v1982_v29  ;;  %1194 = vmatpush2.bf16.msra.mxu1 %v1985_v30 }
 0x13f   :  { %1154 = vmatprep.subr.bf16.mxu0 %v1990_v31  ;;  %1195 = vmatprep.subr.bf16.mxu1 %v1993_v32 }
 0x142   :  { %1155 = vmatpush2.bf16.msra.mxu0 %v1988_v33  ;;  %1196 = vmatpush2.bf16.msra.mxu1 %v1991_v34 }
 0x143   :  { %1156 = vmatprep.subr.bf16.mxu0 %v1996_v35  ;;  %1197 = vmatprep.subr.bf16.mxu1 %v1999_v36 }
 0x146   :  { %1157 = vmatpush2.bf16.msra.mxu0 %v1994_v37  ;;  %1198 = vmatpush2.bf16.msra.mxu1 %v1997_v39 }
 0x147   :  { %1158 = vmatprep.subr.bf16.mxu0 %v2002_v40  ;;  %1199 = vmatprep.subr.bf16.mxu1 %v2005_v41 }
 0x14a   :  { %1159 = vmatpush2.bf16.msra.mxu0 %v2000_v42  ;;  %1200 = vmatpush2.bf16.msra.mxu1 %v2003_v43 }
 0x14b   :  { %1160 = vmatprep.subr.bf16.mxu0 %v2008_v44  ;;  %1201 = vmatprep.subr.bf16.mxu1 %v2011_v46 }
 0x14e   :  { %1161 = vmatpush2.bf16.msra.mxu0 %v2006_v47  ;;  %1202 = vmatpush2.bf16.msra.mxu1 %v2009_v48 }
 0x14f   :  { %1753 = vmatprep.subr.bf16.mxu0 %v2012_v49  ;;  %1775 = vmatprep.subr.bf16.mxu1 %v2028_v58 }
 0x151   :  { %1163 = vmatmul.mubr.bf16.vlgmr.msra.gmra.mxu0 %v2254_v45  ;;  %1204 = vmatmul.mubr.bf16.vlgmr.msra.gmra.mxu1 %v2252_v38  ;;  %v2022_v45 = vld [vmem:[#allocation10 + $0x50] sm:$0xff]  }
 0x152   :  { %1754 = vmatpush3.bf16.msra.mxu0 %v2013_v50  ;;  %1776 = vmatpush3.bf16.msra.mxu1 %v2029_v59  ;;  %v2031_v38 = vld [vmem:[#allocation10 + $0xb0] sm:$0xff]  }
 0x153   :  { %1755 = vmatprep.subr.bf16.mxu0 %v2014_v51  ;;  %1777 = vmatprep.subr.bf16.mxu1 %v2030_v60  ;;  %v1720_v59 = vld [vmem:[%s2283_s6] ss:$0 sm:$0xff] }
 0x156   :  { %1756 = vmatpush3.bf16.msra.mxu0 %v2015_v52  ;;  %1778 = vmatpush3.bf16.msra.mxu1 %v2031_v38 }
 0x157   :  { %1757 = vmatprep.subr.bf16.mxu0 %v2016_v53  ;;  %1779 = vmatprep.subr.bf16.mxu1 %v2032_v62 }
 0x15a   :  { %1758 = vmatpush3.bf16.msra.mxu0 %v2017_v54  ;;  %1780 = vmatpush3.bf16.msra.mxu1 %v2033_v1 }
 0x15b   :  { %1759 = vmatprep.subr.bf16.mxu0 %v2018_v55  ;;  %1781 = vmatprep.subr.bf16.mxu1 %v2034_v2 }
 0x15e   :  { %1760 = vmatpush3.bf16.msra.mxu0 %v2019_v56  ;;  %1782 = vmatpush3.bf16.msra.mxu1 %v2035_v5 }
 0x15f   :  { %1761 = vmatprep.subr.bf16.mxu0 %v2020_v57  ;;  %1783 = vmatprep.subr.bf16.mxu1 %v2036_v6 }
 0x162   :  { %1762 = vmatpush3.bf16.msra.mxu0 %v2021_v61  ;;  %1784 = vmatpush3.bf16.msra.mxu1 %v2037_v8 }
 0x163   :  { %1763 = vmatprep.subr.bf16.mxu0 %v2022_v45  ;;  %1785 = vmatprep.subr.bf16.mxu1 %v2038_v9 }
 0x166   :  { %1764 = vmatpush3.bf16.msra.mxu0 %v2023_v63  ;;  %1786 = vmatpush3.bf16.msra.mxu1 %v2039_v10 }
 0x167   :  { %1765 = vmatprep.subr.bf16.mxu0 %v2024_v0  ;;  %1787 = vmatprep.subr.bf16.mxu1 %v2040_v11 }
 0x16a   :  { %1766 = vmatpush3.bf16.msra.mxu0 %v2025_v3  ;;  %1788 = vmatpush3.bf16.msra.mxu1 %v2041_v12 }
 0x16b   :  { %1767 = vmatprep.subr.bf16.mxu0 %v2026_v4  ;;  %1789 = vmatprep.subr.bf16.mxu1 %v2042_v13 }
 0x16e   :  { %1768 = vmatpush3.bf16.msra.mxu0 %v2027_v7  ;;  %1790 = vmatpush3.bf16.msra.mxu1 %v2043_v17 }
 0x1d1   :  { %v1082_v23 = vpop.f32.mrf.mxu0  ;;  %v1123_v24 = vpop.f32.mrf.mxu1 }
 0x1d2   :  { %v1083_v25 = vadd.f32 %v1082_v23, %v391_v21 }
 0x1d3   :  { %v1084_v26 = vpop.f32.mrf.mxu0  ;;  %v1125_v27 = vpop.f32.mrf.mxu1 }
 0x1d4   :  { %v1124_v28 = vadd.f32 %v1123_v24, %v1083_v25  ;;  %v1085_v29 = vadd.f32 %v1084_v26, %v395_v22 }
 0x1d5   :  { %v1086_v30 = vpop.f32.mrf.mxu0  ;;  %v1127_v31 = vpop.f32.mrf.mxu1 }
 0x1d6   :  { %v1126_v32 = vadd.f32 %v1125_v27, %v1085_v29  ;;  %v1212_v33 = vmax.f32 %v1124_v28, 0.0 }
 0x1d7   :  { %v1087_v34 = vpop.f32.mrf.mxu0  ;;  %v1128_v35 = vpop.f32.mrf.mxu1 }
 0x1d8   :  { %v1213_v36 = vmax.f32 %v1126_v32, 0.0  ;;  %v1216_v39 = vpack.c.bf16 %v1212_v33, %v1212_v33 }
 0x1da   :  { %v1217_v37 = vpack.c.bf16 %v1213_v36, %v1213_v36 }
 0x1dc   :  { %1515 = vmatprep.mubr.bf16.mxu0 %v1217_v37 }
 0x1dd   :  { %1516 = vmatmul.mubr.bf16.vlgmr.msra.gmra.mxu0 %v1216_v39 }
 0x211   :  { %v1164_v40 = vpop.f32.mrf.mxu0  ;;  %v1205_v41 = vpop.f32.mrf.mxu1 }
 0x212   :  { %v1165_v42 = vadd.f32 %v1164_v40, %v399_v15 }
 0x213   :  { %v1166_v43 = vpop.f32.mrf.mxu0  ;;  %v1207_v44 = vpop.f32.mrf.mxu1 }
 0x214   :  { %v1206_v46 = vadd.f32 %v1205_v41, %v1165_v42  ;;  %v1167_v47 = vadd.f32 %v1166_v43, %v403_v18 }
 0x215   :  { %v1168_v48 = vpop.f32.mrf.mxu0  ;;  %v1209_v49 = vpop.f32.mrf.mxu1 }
 0x216   :  { %v1208_v50 = vadd.f32 %v1207_v44, %v1167_v47  ;;  %v1214_v51 = vmax.f32 %v1206_v46, 0.0 }
 0x217   :  { %v1169_v52 = vpop.f32.mrf.mxu0  ;;  %v1210_v53 = vpop.f32.mrf.mxu1 }
 0x218   :  { %v1215_v54 = vmax.f32 %v1208_v50, 0.0  ;;  %v1218_v56 = vpack.c.bf16 %v1214_v51, %v1214_v51 }
 0x21a   :  { %v1219_v55 = vpack.c.bf16 %v1215_v54, %v1215_v54 }
 0x21c   :  { %1555 = vmatprep.mubr.bf16.mxu1 %v1219_v55 }
 0x21d   :  { %1556 = vmatmul.mubr.bf16.vlgmr.msra.gmra.mxu1 %v1218_v56 }
 0x29d   :  { %v1769_v14 = vpop.f32.mrf.mxu0 }
 0x29f   :  { %v1770_v16 = vpop.f32.mrf.mxu0 }
 0x2a0   :  { %v1771_v58 = vadd.f32 %v1770_v16, %v1769_v14 }
 0x2a1   :  { %v1772_v19 = vpop.f32.mrf.mxu0 }
 0x2a2   :  { %v1518_v45 = vadd.f32 %v1771_v58, %v1720_v59 }
 0x2a3   :  { %v1773_v57 = vpop.f32.mrf.mxu0 }
 0x2dd   :  { %v1791_v60 = vpop.f32.mrf.mxu1 }
 0x2df   :  { %v1792_v61 = vpop.f32.mrf.mxu1 }
 0x2e0   :  { %v1793_v38 = vadd.f32 %v1792_v61, %v1791_v60 }
 0x2e1   :  { %v1794_v62 = vpop.f32.mrf.mxu1 }
 0x2e2   :  { %v1558_v63 = vadd.f32 %v1793_v38, %v1518_v45 }
 0x2e3   :  { %v1795_v0 = vpop.f32.mrf.mxu1 }
 0x2e4   :  { %v1563_v1 = vpack.c.bf16 %v1558_v63, %v1558_v63 }
 0x2e6   :  { %1564 = vst [vmem:[#allocation11] sm:$0xf] %v1563_v1 }
 0x2e7   :  { %2155 = shalt.err (!%p2152_p1)
}
 0x2e8   :  { %1574 = dma.vmem_to_hbm [thread:$0]  %s1572_s29, 64, %s2284_s7, [#allocation4]  }
 0x2e9   :  { %2170 = dma.done.wait [#allocation4], 64  }
 0x2ea   :  { %2171 = vsyncadd [#allocation4], 4294967232 }
 0x2eb   :  { %1578 = vsyncpa [#allocation3], 1 }
 0x2ec   :  { %1579 = vsyncpa [#allocation6], 1 }
 0x2ed   :  { %1580 = vsyncpa [#allocation9], 1 }
 0x2ee   :  { %1581 = vsyncpa [#allocation4], 1 }

// kernel: tpu_custom_call.1
= control target key start
LH: loop header
LB: loop body
LE: loop exit
PB: predicated region body
PF: predicated region fallthrough
CT: control target
= control target key end

     0   :  { %12 = vsyncpa [#allocation3], 0  ;;  %s2277_s0 = inlined_call_operand.hbm [shape: f32[8,32], index: 0, kind: input, shape index: {}]   ;;  %s2278_s1 = inlined_call_operand.hbm [shape: bf16[32,512], index: 1, kind: input, shape index: {}]   ;;  %s2279_s2 = inlined_call_operand.hbm [shape: f32[1,512], index: 2, kind: input, shape index: {}]   ;;  %s2280_s3 = inlined_call_operand.hbm [shape: bf16[512,512], index: 3, kind: input, shape index: {}]   ;;  %s2281_s4 = inlined_call_operand.vmem [shape: f32[1,512], index: 4, kind: input, shape index: {}]   ;;  %s2282_s5 = inlined_call_operand.hbm [shape: bf16[512,128], index: 5, kind: input, shape index: {}]   ;;  %s2283_s6 = inlined_call_operand.vmem [shape: f32[1,128], index: 6, kind: input, shape index: {}]   ;;  %s2284_s7 = inlined_call_operand.hbm [shape: bf16[8,128], index: 7, kind: output, shape index: {}]  }
   0x1   :  { %13 = vsyncpa [#allocation6], 0 }
   0x2   :  { %14 = vsyncpa [#allocation9], 0 }
   0x3   :  { %15 = vsyncpa [#allocation4], 0  ;;  %s2172_s24 = smov [#allocation5]  }
   0x4   :  { %s31_s25 = sshll.u32 %s2172_s24, 4  ;;  %s32_s25 = int_to_ptr.vmem [resolvable:$true] %s31_s25 }
   0x5   :  { %s2052_s26 = scalar_lea.vmem %s32_s25, 1024  ;;  %p2057_p1 = scmp.lt.s32.totalorder %s32_s25, %s32_s25 }
   0x6   :  { %p2053_p0 = scmp.ne.s32.totalorder %s32_s25, %s2052_s26  ;;  %p2058_p2 = scmp.lt.s32.totalorder %s2052_s26, %s2052_s26 }
   0x8   :  { %p2059_p3 = por %p2058_p2, %p2057_p1 }
   0xa   :  { %p2060_p4 = pnand %p2059_p3, %p2053_p0 }
   0xc   :  { %2063 = shalt.err (!%p2060_p4)
}
   0xd   :  { %s2173_s27 = smov 256   ;;  %s2174_s28 = smov 16  }
   0xe   :  { %37 = dma.hbm_to_vmem [thread:$0]  %s2278_s1, 1024, %s32_s25, [#allocation6], %s2173_s27, %s2173_s27, %s2174_s28  }
   0xf   :  { %s2175_s8 = smov [#allocation8]   ;;  %s2176_s10 = smov [#allocation2]  }
  0x10   :  { %s53_s9 = sshll.u32 %s2175_s8, 4  ;;  %s22_s11 = sshll.u32 %s2176_s10, 4  ;;  %s54_s9 = int_to_ptr.vmem [resolvable:$true] %s53_s9  ;;  %s23_s11 = int_to_ptr.vmem [resolvable:$true] %s22_s11 }
  0x11   :  { %s2072_s12 = scalar_lea.vmem %s54_s9, 16384  ;;  %p2077_p6 = scmp.lt.s32.totalorder %s54_s9, %s54_s9 }
  0x12   :  { %p2073_p5 = scmp.ne.s32.totalorder %s54_s9, %s2072_s12  ;;  %p2078_p7 = scmp.lt.s32.totalorder %s2072_s12, %s2072_s12 }
  0x14   :  { %p2079_p8 = por %p2078_p7, %p2077_p6 }
  0x16   :  { %p2080_p9 = pnand %p2079_p8, %p2073_p5 }
  0x18   :  { %2083 = shalt.err (!%p2080_p9)
}
  0x19   :  { %59 = dma.hbm_to_vmem [thread:$0]  %s2280_s3, 16384, %s54_s9, [#allocation9], %s2173_s27, %s2173_s27, %s2174_s28  }
  0x1a   :  { %s2092_s15 = scalar_lea.vmem %s23_s11, 128  ;;  %p2097_p11 = scmp.lt.s32.totalorder %s23_s11, %s23_s11 }
  0x1b   :  { %p2093_p10 = scmp.ne.s32.totalorder %s23_s11, %s2092_s15  ;;  %p2098_p12 = scmp.lt.s32.totalorder %s2092_s15, %s2092_s15 }
  0x1d   :  { %p2099_p13 = por %p2098_p12, %p2097_p11 }
  0x1f   :  { %p2100_p0 = pnand %p2099_p13, %p2093_p10 }
  0x21   :  { %2103 = shalt.err (!%p2100_p0)
}
  0x22   :  { %25 = dma.hbm_to_vmem [thread:$0]  %s2277_s0, 128, %s23_s11, [#allocation3]  }
  0x23   :  { %s2177_s17 = smov [#allocation7]   ;;  %s2178_s19 = smov [#allocation10]  }
  0x24   :  { %s44_s18 = sshll.u32 %s2177_s17, 4  ;;  %s67_s20 = sshll.u32 %s2178_s19, 4  ;;  %s45_s18 = int_to_ptr.vmem [resolvable:$true] %s44_s18  ;;  %s68_s20 = int_to_ptr.vmem [resolvable:$true] %s67_s20 }
  0x25   :  { %s2112_s21 = scalar_lea.vmem %s45_s18, 64  ;;  %p2117_p2 = scmp.lt.s32.totalorder %s45_s18, %s45_s18 }
  0x26   :  { %p2113_p1 = scmp.ne.s32.totalorder %s45_s18, %s2112_s21  ;;  %p2118_p3 = scmp.lt.s32.totalorder %s2112_s21, %s2112_s21 }
  0x28   :  { %p2119_p4 = por %p2118_p3, %p2117_p2 }
  0x2a   :  { %p2120_p5 = pnand %p2119_p4, %p2113_p1 }
  0x2c   :  { %2123 = shalt.err (!%p2120_p5)
}
  0x2d   :  { %47 = dma.hbm_to_vmem [thread:$0]  %s2279_s2, 64, %s45_s18, [#allocation6]  }
  0x2e   :  { %s2132_s23 = scalar_lea.vmem %s68_s20, 4096  ;;  %p2137_p7 = scmp.lt.s32.totalorder %s68_s20, %s68_s20 }
  0x2f   :  { %p2133_p6 = scmp.ne.s32.totalorder %s68_s20, %s2132_s23  ;;  %p2138_p8 = scmp.lt.s32.totalorder %s2132_s23, %s2132_s23 }
  0x31   :  { %p2139_p9 = por %p2138_p8, %p2137_p7 }
  0x33   :  { %p2140_p10 = pnand %p2139_p9, %p2133_p6 }
  0x35   :  { %2143 = shalt.err (!%p2140_p10)
}
  0x36   :  { %s2179_s0 = smov 64   ;;  %s2180_s24 = smov 4  }
  0x37   :  { %73 = dma.hbm_to_vmem [thread:$0]  %s2282_s5, 4096, %s68_s20, [#allocation9], %s2179_s0, %s2179_s0, %s2180_s24  }
  0x38   :  { %2164 = dma.done.wait [#allocation3], 128  }
  0x39   :  { %2165 = vsyncadd [#allocation3], 4294967168 }
  0x3a   :  { %2166 = dma.done.wait [#allocation6], 1088  }
  0x3b   :  { %2167 = vsyncadd [#allocation6], 4294966208 }
  0x3c   :  { %2168 = dma.done.wait [#allocation9], 20480  }
  0x3d   :  { %2169 = vsyncadd [#allocation9], 4294946816  ;;  %v2181_v0 = vmov 0   ;;  %v1808_v1 = vld [vmem:[#allocation5 + $0x24] ss:$16 sps:$4 sm:$0xff]   ;;  %v92_v9 = vld [vmem:[#allocation2] sm:$0xff] }
  0x3e   :  { %200 = vmatprep.mubr.bf16.mxu0 %v2181_v0  ;;  %241 = vmatprep.mubr.bf16.mxu1 %v2181_v0  ;;  %v1810_v2 = vld [vmem:[#allocation5 + $0x2c] ss:$16 sps:$4 sm:$0xff]   ;;  %v1812_v3 = vld [vmem:[#allocation5 + $0x20] ss:$16 sps:$4 sm:$0xff]   ;;  %v1813_v4 = vld [vmem:[#allocation5 + $0x28] ss:$16 sps:$4 sm:$0xff]   ;;  %v93_v12 = vpack.c.bf16 %v92_v9, %v92_v9 }
  0x3f   :  { %180 = vmatprep.subr.bf16.mxu0 %v1808_v1  ;;  %221 = vmatprep.subr.bf16.mxu1 %v1810_v2  ;;  %v1814_v5 = vld [vmem:[#allocation5 + $0x4] ss:$16 sps:$4 sm:$0xff]   ;;  %v1816_v6 = vld [vmem:[#allocation5 + $0xc] ss:$16 sps:$4 sm:$0xff]   ;;  %v1818_v7 = vld [vmem:[#allocation5] ss:$16 sps:$4 sm:$0xff]  }
  0x40   :  { %181 = vmatpush1.bf16.msra.mxu0 %v1812_v3  ;;  %222 = vmatpush1.bf16.msra.mxu1 %v1813_v4  ;;  %v1819_v8 = vld [vmem:[#allocation5 + $0x8] ss:$16 sps:$4 sm:$0xff]   ;;  %v1820_v10 = vld [vmem:[#allocation8 + $0xe0] ss:$16 sps:$4 sm:$0xff]   ;;  %vm164_vm0 = vcmask 261120   ;;  %s2182_s28 = smov [#allocation11]  }
  0x41   :  { %182 = vmatprep.subr.bf16.mxu0 %v1814_v5  ;;  %223 = vmatprep.subr.bf16.mxu1 %v1816_v6  ;;  %v1822_v11 = vld [vmem:[#allocation8 + $0xe4] ss:$16 sps:$4 sm:$0xff]   ;;  %v1823_v13 = vld [vmem:[#allocation8 + $0x2e0] ss:$16 sps:$4 sm:$0xff]   ;;  %s1571_s29 = sshll.u32 %s2182_s28, 4  ;;  %s1572_s29 = int_to_ptr.vmem [resolvable:$true] %s1571_s29 }
  0x42   :  { %v1825_v14 = vld [vmem:[#allocation8 + $0x2e4] ss:$16 sps:$4 sm:$0xff]   ;;  %v1826_v17 = vld [vmem:[#allocation8 + $0xc0] ss:$16 sps:$4 sm:$0xff]   ;;  %s2144_s30 = scalar_lea.vmem %s1572_s29, 64  ;;  %p2149_p12 = scmp.lt.s32.totalorder %s1572_s29, %s1572_s29 }
  0x43   :  { %v1828_v15 = vld [vmem:[#allocation8 + $0xc4] ss:$16 sps:$4 sm:$0xff]   ;;  %v1829_v18 = vld [vmem:[#allocation8 + $0x2c0] ss:$16 sps:$4 sm:$0xff]   ;;  %p2145_p11 = scmp.ne.s32.totalorder %s1572_s29, %s2144_s30  ;;  %p2150_p13 = scmp.lt.s32.totalorder %s2144_s30, %s2144_s30 }
  0x44   :  { %183 = vmatpush1.bf16.msra.mxu0 %v1818_v7  ;;  %224 = vmatpush1.bf16.msra.mxu1 %v1819_v8  ;;  %v1831_v16 = vld [vmem:[#allocation8 + $0x2c4] ss:$16 sps:$4 sm:$0xff]   ;;  %v1832_v21 = vld [vmem:[#allocation8 + $0xa0] ss:$16 sps:$4 sm:$0xff]  }
  0x45   :  { %1048 = vmatprep.subr.bf16.mxu0 %v1822_v11  ;;  %1089 = vmatprep.subr.bf16.mxu1 %v1825_v14  ;;  %v1834_v19 = vld [vmem:[#allocation8 + $0xa4] ss:$16 sps:$4 sm:$0xff]   ;;  %v1835_v22 = vld [vmem:[#allocation8 + $0x2a0] ss:$16 sps:$4 sm:$0xff]   ;;  %v1918_v11 = vld [vmem:[#allocation8 + $0xec] ss:$16 sps:$4 sm:$0xff]   ;;  %p2151_p0 = por %p2150_p13, %p2149_p12 }
  0x46   :  { %v1837_v20 = vld [vmem:[#allocation8 + $0x2a4] ss:$16 sps:$4 sm:$0xff]   ;;  %v1838_v25 = vld [vmem:[#allocation8 + $0x80] ss:$16 sps:$4 sm:$0xff]  }
  0x47   :  { %1590 = vmatmul.mubr.msk.bf16.vlgmr.msra.gmra.mxu0 %vm164_vm0, %v93_v12  ;;  %1591 = vmatmul.mubr.msk.bf16.vlgmr.msra.gmra.mxu1 %vm164_vm0, %v93_v12  ;;  %v1840_v23 = vld [vmem:[#allocation8 + $0x84] ss:$16 sps:$4 sm:$0xff]   ;;  %v1841_v26 = vld [vmem:[#allocation8 + $0x280] ss:$16 sps:$4 sm:$0xff]   ;;  %v1921_v12 = vld [vmem:[#allocation8 + $0x2ec] ss:$16 sps:$4 sm:$0xff]   ;;  %p2152_p1 = pnand %p2151_p0, %p2145_p11 }
  0x48   :  { %1049 = vmatpush1.bf16.msra.mxu0 %v1820_v10  ;;  %1090 = vmatpush1.bf16.msra.mxu1 %v1823_v13  ;;  %v1843_v24 = vld [vmem:[#allocation8 + $0x284] ss:$16 sps:$4 sm:$0xff]   ;;  %v1844_v29 = vld [vmem:[#allocation8 + $0x60] ss:$16 sps:$4 sm:$0xff]   ;;  %v104_v13 = vlaneseq }
  0x49   :  { %1050 = vmatprep.subr.bf16.mxu0 %v1828_v15  ;;  %1091 = vmatprep.subr.bf16.mxu1 %v1831_v16  ;;  %v1846_v27 = vld [vmem:[#allocation8 + $0x64] ss:$16 sps:$4 sm:$0xff]   ;;  %v1847_v30 = vld [vmem:[#allocation8 + $0x260] ss:$16 sps:$4 sm:$0xff]  }
  0x4a   :  { %v1849_v28 = vld [vmem:[#allocation8 + $0x264] ss:$16 sps:$4 sm:$0xff]   ;;  %v1850_v33 = vld [vmem:[#allocation8 + $0x40] ss:$16 sps:$4 sm:$0xff]   ;;  %v2238_v14 = vshrl.u32 %v104_v13, 7 }
  0x4b   :  { %v1852_v31 = vld [vmem:[#allocation8 + $0x44] ss:$16 sps:$4 sm:$0xff]   ;;  %v1853_v34 = vld [vmem:[#allocation8 + $0x240] ss:$16 sps:$4 sm:$0xff]   ;;  %v1967_v13 = vld [vmem:[#allocation8 + $0x3e8] ss:$16 sps:$4 sm:$0xff]  }
  0x4c   :  { %1051 = vmatpush1.bf16.msra.mxu0 %v1826_v17  ;;  %1092 = vmatpush1.bf16.msra.mxu1 %v1829_v18  ;;  %v1855_v32 = vld [vmem:[#allocation8 + $0x244] ss:$16 sps:$4 sm:$0xff]   ;;  %v1856_v37 = vld [vmem:[#allocation8 + $0x20] ss:$16 sps:$4 sm:$0xff]   ;;  %v106_v15 = vsub.s32 0, %v2238_v14  ;;  %v114_v16 = vsub.s32 2, %v2238_v14 }
  0x4d   :  { %1052 = vmatprep.subr.bf16.mxu0 %v1834_v19  ;;  %1093 = vmatprep.subr.bf16.mxu1 %v1837_v20  ;;  %v1858_v35 = vld [vmem:[#allocation8 + $0x24] ss:$16 sps:$4 sm:$0xff]   ;;  %v1859_v38 = vld [vmem:[#allocation8 + $0x220] ss:$16 sps:$4 sm:$0xff]   ;;  %v102_v17 = vld [vmem:[#allocation7] sm:$0xf] }
  0x4e   :  { %v1861_v36 = vld [vmem:[#allocation8 + $0x224] ss:$16 sps:$4 sm:$0xff]   ;;  %v1862_v41 = vld [vmem:[#allocation8] ss:$16 sps:$4 sm:$0xff]   ;;  %v110_v18 = vsub.s32 1, %v2238_v14  ;;  %v118_v19 = vsub.s32 3, %v2238_v14  ;;  %v107_v20 = vrot.slane %v102_v17, %v106_v15 }
  0x4f   :  { %v1864_v39 = vld [vmem:[#allocation8 + $0x4] ss:$16 sps:$4 sm:$0xff]   ;;  %v1865_v42 = vld [vmem:[#allocation8 + $0x200] ss:$16 sps:$4 sm:$0xff]  }
  0x50   :  { %1053 = vmatpush1.bf16.msra.mxu0 %v1832_v21  ;;  %1094 = vmatpush1.bf16.msra.mxu1 %v1835_v22  ;;  %v1867_v40 = vld [vmem:[#allocation8 + $0x204] ss:$16 sps:$4 sm:$0xff]   ;;  %v1868_v45 = vld [vmem:[#allocation8 + $0x1e0] ss:$16 sps:$4 sm:$0xff]   ;;  %v115_v21 = vrot.slane %v102_v17, %v114_v16  ;;  %v111_v22 = vrot.slane %v102_v17, %v110_v18 }
  0x51   :  { %1054 = vmatprep.subr.bf16.mxu0 %v1840_v23  ;;  %1095 = vmatprep.subr.bf16.mxu1 %v1843_v24  ;;  %v1870_v43 = vld [vmem:[#allocation8 + $0x1e4] ss:$16 sps:$4 sm:$0xff]   ;;  %v1871_v46 = vld [vmem:[#allocation8 + $0x3e0] ss:$16 sps:$4 sm:$0xff]   ;;  %v119_v23 = vrot.slane %v102_v17, %v118_v19  ;;  %v1972_v17 = vld [vmem:[#allocation8 + $0x1cc] ss:$16 sps:$4 sm:$0xff]  }
  0x52   :  { %v1873_v44 = vld [vmem:[#allocation8 + $0x3e4] ss:$16 sps:$4 sm:$0xff]   ;;  %v1874_v49 = vld [vmem:[#allocation8 + $0x1c0] ss:$16 sps:$4 sm:$0xff]  }
  0x53   :  { %v1876_v47 = vld [vmem:[#allocation8 + $0x1c4] ss:$16 sps:$4 sm:$0xff]   ;;  %v1877_v50 = vld [vmem:[#allocation8 + $0x3c0] ss:$16 sps:$4 sm:$0xff]  }
  0x54   :  { %1055 = vmatpush1.bf16.msra.mxu0 %v1838_v25  ;;  %1096 = vmatpush1.bf16.msra.mxu1 %v1841_v26  ;;  %v1879_v48 = vld [vmem:[#allocation8 + $0x3c4] ss:$16 sps:$4 sm:$0xff]   ;;  %v1880_v53 = vld [vmem:[#allocation8 + $0x1a0] ss:$16 sps:$4 sm:$0xff]  }
  0x55   :  { %1056 = vmatprep.subr.bf16.mxu0 %v1846_v27  ;;  %1097 = vmatprep.subr.bf16.mxu1 %v1849_v28  ;;  %v1882_v51 = vld [vmem:[#allocation8 + $0x1a4] ss:$16 sps:$4 sm:$0xff]   ;;  %v1883_v54 = vld [vmem:[#allocation8 + $0x3a0] ss:$16 sps:$4 sm:$0xff]  }
  0x56   :  { %v1885_v52 = vld [vmem:[#allocation8 + $0x3a4] ss:$16 sps:$4 sm:$0xff]   ;;  %v1886_v57 = vld [vmem:[#allocation8 + $0x180] ss:$16 sps:$4 sm:$0xff]  }
  0x57   :  { %v1888_v55 = vld [vmem:[#allocation8 + $0x184] ss:$16 sps:$4 sm:$0xff]   ;;  %v1889_v58 = vld [vmem:[#allocation8 + $0x380] ss:$16 sps:$4 sm:$0xff]  }
  0x58   :  { %1057 = vmatpush1.bf16.msra.mxu0 %v1844_v29  ;;  %1098 = vmatpush1.bf16.msra.mxu1 %v1847_v30  ;;  %v1891_v56 = vld [vmem:[#allocation8 + $0x384] ss:$16 sps:$4 sm:$0xff]   ;;  %v1892_v61 = vld [vmem:[#allocation8 + $0x160] ss:$16 sps:$4 sm:$0xff]  }
  0x59   :  { %1058 = vmatprep.subr.bf16.mxu0 %v1852_v31  ;;  %1099 = vmatprep.subr.bf16.mxu1 %v1855_v32  ;;  %v1894_v59 = vld [vmem:[#allocation8 + $0x164] ss:$16 sps:$4 sm:$0xff]   ;;  %v1895_v62 = vld [vmem:[#allocation8 + $0x360] ss:$16 sps:$4 sm:$0xff]  }
  0x5a   :  { %v1897_v60 = vld [vmem:[#allocation8 + $0x364] ss:$16 sps:$4 sm:$0xff]   ;;  %v1898_v1 = vld [vmem:[#allocation8 + $0x140] ss:$16 sps:$4 sm:$0xff]  }
  0x5b   :  { %v1900_v63 = vld [vmem:[#allocation8 + $0x144] ss:$16 sps:$4 sm:$0xff]   ;;  %v1901_v2 = vld [vmem:[#allocation8 + $0x340] ss:$16 sps:$4 sm:$0xff]  }
  0x5c   :  { %1059 = vmatpush1.bf16.msra.mxu0 %v1850_v33  ;;  %1100 = vmatpush1.bf16.msra.mxu1 %v1853_v34  ;;  %v1903_v0 = vld [vmem:[#allocation8 + $0x344] ss:$16 sps:$4 sm:$0xff]   ;;  %v1904_v5 = vld [vmem:[#allocation8 + $0x120] ss:$16 sps:$4 sm:$0xff]  }
  0x5d   :  { %1060 = vmatprep.subr.bf16.mxu0 %v1858_v35  ;;  %1101 = vmatprep.subr.bf16.mxu1 %v1861_v36  ;;  %v1906_v3 = vld [vmem:[#allocation8 + $0x124] ss:$16 sps:$4 sm:$0xff]   ;;  %v1907_v6 = vld [vmem:[#allocation8 + $0x320] ss:$16 sps:$4 sm:$0xff]  }
  0x5e   :  { %v1909_v4 = vld [vmem:[#allocation8 + $0x324] ss:$16 sps:$4 sm:$0xff]   ;;  %v1910_v9 = vld [vmem:[#allocation8 + $0x100] ss:$16 sps:$4 sm:$0xff]  }
  0x5f   :  { %v1912_v7 = vld [vmem:[#allocation8 + $0x104] ss:$16 sps:$4 sm:$0xff]   ;;  %v1913_v10 = vld [vmem:[#allocation8 + $0x300] ss:$16 sps:$4 sm:$0xff]  }
  0x60   :  { %1061 = vmatpush1.bf16.msra.mxu0 %v1856_v37  ;;  %1102 = vmatpush1.bf16.msra.mxu1 %v1859_v38  ;;  %v1915_v8 = vld [vmem:[#allocation8 + $0x304] ss:$16 sps:$4 sm:$0xff]  }
  0x61   :  { %1062 = vmatprep.subr.bf16.mxu0 %v1864_v39  ;;  %1103 = vmatprep.subr.bf16.mxu1 %v1867_v40 }
  0x64   :  { %1063 = vmatpush1.bf16.msra.mxu0 %v1862_v41  ;;  %1104 = vmatpush1.bf16.msra.mxu1 %v1865_v42 }
  0x65   :  { %1064 = vmatprep.subr.bf16.mxu0 %v1870_v43  ;;  %1105 = vmatprep.subr.bf16.mxu1 %v1873_v44  ;;  %v1916_v43 = vld [vmem:[#allocation8 + $0xe8] ss:$16 sps:$4 sm:$0xff]  }
  0x66   :  { %v1919_v44 = vld [vmem:[#allocation8 + $0x2e8] ss:$16 sps:$4 sm:$0xff]  }
  0x68   :  { %1065 = vmatpush2.bf16.msra.mxu0 %v1868_v45  ;;  %1106 = vmatpush2.bf16.msra.mxu1 %v1871_v46  ;;  %v1924_v46 = vld [vmem:[#allocation8 + $0xcc] ss:$16 sps:$4 sm:$0xff]  }
  0x69   :  { %1066 = vmatprep.subr.bf16.mxu0 %v1876_v47  ;;  %1107 = vmatprep.subr.bf16.mxu1 %v1879_v48  ;;  %v1927_v47 = vld [vmem:[#allocation8 + $0x2cc] ss:$16 sps:$4 sm:$0xff]   ;;  %v1922_v48 = vld [vmem:[#allocation8 + $0xc8] ss:$16 sps:$4 sm:$0xff]  }
  0x6c   :  { %1067 = vmatpush2.bf16.msra.mxu0 %v1874_v49  ;;  %1108 = vmatpush2.bf16.msra.mxu1 %v1877_v50  ;;  %v1925_v49 = vld [vmem:[#allocation8 + $0x2c8] ss:$16 sps:$4 sm:$0xff]   ;;  %v1930_v50 = vld [vmem:[#allocation8 + $0xac] ss:$16 sps:$4 sm:$0xff]  }
  0x6d   :  { %1068 = vmatprep.subr.bf16.mxu0 %v1882_v51  ;;  %1109 = vmatprep.subr.bf16.mxu1 %v1885_v52  ;;  %v1933_v51 = vld [vmem:[#allocation8 + $0x2ac] ss:$16 sps:$4 sm:$0xff]   ;;  %v1928_v52 = vld [vmem:[#allocation8 + $0xa8] ss:$16 sps:$4 sm:$0xff]  }
  0x70   :  { %1069 = vmatpush2.bf16.msra.mxu0 %v1880_v53  ;;  %1110 = vmatpush2.bf16.msra.mxu1 %v1883_v54  ;;  %v1931_v53 = vld [vmem:[#allocation8 + $0x2a8] ss:$16 sps:$4 sm:$0xff]   ;;  %v1936_v54 = vld [vmem:[#allocation8 + $0x8c] ss:$16 sps:$4 sm:$0xff]  }
  0x71   :  { %1070 = vmatprep.subr.bf16.mxu0 %v1888_v55  ;;  %1111 = vmatprep.subr.bf16.mxu1 %v1891_v56  ;;  %v1939_v55 = vld [vmem:[#allocation8 + $0x28c] ss:$16 sps:$4 sm:$0xff]   ;;  %v1934_v56 = vld [vmem:[#allocation8 + $0x88] ss:$16 sps:$4 sm:$0xff]  }
  0x74   :  { %1071 = vmatpush2.bf16.msra.mxu0 %v1886_v57  ;;  %1112 = vmatpush2.bf16.msra.mxu1 %v1889_v58  ;;  %v1937_v57 = vld [vmem:[#allocation8 + $0x288] ss:$16 sps:$4 sm:$0xff]   ;;  %v1942_v58 = vld [vmem:[#allocation8 + $0x6c] ss:$16 sps:$4 sm:$0xff]  }
  0x75   :  { %1072 = vmatprep.subr.bf16.mxu0 %v1894_v59  ;;  %1113 = vmatprep.subr.bf16.mxu1 %v1897_v60  ;;  %v1945_v59 = vld [vmem:[#allocation8 + $0x26c] ss:$16 sps:$4 sm:$0xff]   ;;  %v1940_v60 = vld [vmem:[#allocation8 + $0x68] ss:$16 sps:$4 sm:$0xff]  }
  0x78   :  { %1073 = vmatpush2.bf16.msra.mxu0 %v1892_v61  ;;  %1114 = vmatpush2.bf16.msra.mxu1 %v1895_v62  ;;  %v1943_v61 = vld [vmem:[#allocation8 + $0x268] ss:$16 sps:$4 sm:$0xff]   ;;  %v1948_v62 = vld [vmem:[#allocation8 + $0x4c] ss:$16 sps:$4 sm:$0xff]  }
  0x79   :  { %1074 = vmatprep.subr.bf16.mxu0 %v1900_v63  ;;  %1115 = vmatprep.subr.bf16.mxu1 %v1903_v0  ;;  %v1951_v63 = vld [vmem:[#allocation8 + $0x24c] ss:$16 sps:$4 sm:$0xff]   ;;  %v1946_v0 = vld [vmem:[#allocation8 + $0x48] ss:$16 sps:$4 sm:$0xff]  }
  0x7c   :  { %1075 = vmatpush2.bf16.msra.mxu0 %v1898_v1  ;;  %1116 = vmatpush2.bf16.msra.mxu1 %v1901_v2  ;;  %v1949_v1 = vld [vmem:[#allocation8 + $0x248] ss:$16 sps:$4 sm:$0xff]   ;;  %v1954_v2 = vld [vmem:[#allocation8 + $0x2c] ss:$16 sps:$4 sm:$0xff]  }
  0x7d   :  { %1076 = vmatprep.subr.bf16.mxu0 %v1906_v3  ;;  %1117 = vmatprep.subr.bf16.mxu1 %v1909_v4  ;;  %v1957_v3 = vld [vmem:[#allocation8 + $0x22c] ss:$16 sps:$4 sm:$0xff]   ;;  %v1952_v4 = vld [vmem:[#allocation8 + $0x28] ss:$16 sps:$4 sm:$0xff]  }
  0x80   :  { %1077 = vmatpush2.bf16.msra.mxu0 %v1904_v5  ;;  %1118 = vmatpush2.bf16.msra.mxu1 %v1907_v6  ;;  %v1955_v5 = vld [vmem:[#allocation8 + $0x228] ss:$16 sps:$4 sm:$0xff]   ;;  %v1960_v6 = vld [vmem:[#allocation8 + $0xc] ss:$16 sps:$4 sm:$0xff]  }
  0x81   :  { %1078 = vmatprep.subr.bf16.mxu0 %v1912_v7  ;;  %1119 = vmatprep.subr.bf16.mxu1 %v1915_v8  ;;  %v1963_v7 = vld [vmem:[#allocation8 + $0x20c] ss:$16 sps:$4 sm:$0xff]   ;;  %v1958_v8 = vld [vmem:[#allocation8 + $0x8] ss:$16 sps:$4 sm:$0xff]  }
  0x84   :  { %1079 = vmatpush2.bf16.msra.mxu0 %v1910_v9  ;;  %1120 = vmatpush2.bf16.msra.mxu1 %v1913_v10  ;;  %v1961_v9 = vld [vmem:[#allocation8 + $0x208] ss:$16 sps:$4 sm:$0xff]   ;;  %v1966_v10 = vld [vmem:[#allocation8 + $0x1ec] ss:$16 sps:$4 sm:$0xff]  }
  0x85   :  { %1130 = vmatprep.subr.bf16.mxu0 %v1918_v11  ;;  %1171 = vmatprep.subr.bf16.mxu1 %v1921_v12  ;;  %v1969_v11 = vld [vmem:[#allocation8 + $0x3ec] ss:$16 sps:$4 sm:$0xff]   ;;  %v1964_v12 = vld [vmem:[#allocation8 + $0x1e8] ss:$16 sps:$4 sm:$0xff]  }
 0x107   :  { %v202_v24 = vpop.f32.mrf.mxu0  ;;  %v243_v25 = vpop.f32.mrf.mxu1 }
 0x108   :  { %v203_v26 = vadd.f32 %v202_v24, %v107_v20  ;;  %v244_v27 = vadd.f32 %v243_v25, %v115_v21  ;;  %v1975_v20 = vld [vmem:[#allocation8 + $0x3cc] ss:$16 sps:$4 sm:$0xff]   ;;  %v1970_v21 = vld [vmem:[#allocation8 + $0x1c8] ss:$16 sps:$4 sm:$0xff]  }
 0x109   :  { %v204_v28 = vpop.f32.mrf.mxu0  ;;  %v245_v29 = vpop.f32.mrf.mxu1  ;;  %v1981_v24 = vld [vmem:[#allocation8 + $0x3ac] ss:$16 sps:$4 sm:$0xff]   ;;  %v1976_v25 = vld [vmem:[#allocation8 + $0x1a8] ss:$16 sps:$4 sm:$0xff]  }
 0x10a   :  { %v252_v30 = vmax.f32 %v244_v27, 0.0  ;;  %v205_v31 = vadd.f32 %v204_v28, %v111_v22  ;;  %v246_v32 = vadd.f32 %v245_v29, %v119_v23  ;;  %v250_v33 = vmax.f32 %v203_v26, 0.0  ;;  %v1973_v22 = vld [vmem:[#allocation8 + $0x3c8] ss:$16 sps:$4 sm:$0xff]   ;;  %v1978_v23 = vld [vmem:[#allocation8 + $0x1ac] ss:$16 sps:$4 sm:$0xff]  }
 0x10b   :  { %v206_v34 = vpop.f32.mrf.mxu0  ;;  %v247_v35 = vpop.f32.mrf.mxu1  ;;  %v1979_v26 = vld [vmem:[#allocation8 + $0x3a8] ss:$16 sps:$4 sm:$0xff]   ;;  %v1984_v27 = vld [vmem:[#allocation8 + $0x18c] ss:$16 sps:$4 sm:$0xff]  }
 0x10c   :  { %v251_v36 = vmax.f32 %v205_v31, 0.0  ;;  %v253_v37 = vmax.f32 %v246_v32, 0.0  ;;  %v2252_v38 = vpack.c.bf16 %v252_v30, %v252_v30  ;;  %v2254_v45 = vpack.c.bf16 %v250_v33, %v250_v33  ;;  %v1987_v28 = vld [vmem:[#allocation8 + $0x38c] ss:$16 sps:$4 sm:$0xff]   ;;  %v1982_v29 = vld [vmem:[#allocation8 + $0x188] ss:$16 sps:$4 sm:$0xff]  }
 0x10d   :  { %v207_v39 = vpop.f32.mrf.mxu0  ;;  %v248_v40 = vpop.f32.mrf.mxu1  ;;  %v1985_v30 = vld [vmem:[#allocation8 + $0x388] ss:$16 sps:$4 sm:$0xff]   ;;  %v1990_v31 = vld [vmem:[#allocation8 + $0x16c] ss:$16 sps:$4 sm:$0xff]  }
 0x10e   :  { %v255_v41 = vpack.c.bf16 %v251_v36, %v251_v36  ;;  %v257_v42 = vpack.c.bf16 %v253_v37, %v253_v37  ;;  %v1993_v32 = vld [vmem:[#allocation8 + $0x36c] ss:$16 sps:$4 sm:$0xff]   ;;  %v1988_v33 = vld [vmem:[#allocation8 + $0x168] ss:$16 sps:$4 sm:$0xff]  }
 0x10f   :  { %v1991_v34 = vld [vmem:[#allocation8 + $0x368] ss:$16 sps:$4 sm:$0xff]   ;;  %v1996_v35 = vld [vmem:[#allocation8 + $0x14c] ss:$16 sps:$4 sm:$0xff]  }
 0x110   :  { %1080 = vmatprep.mubr.bf16.mxu0 %v255_v41  ;;  %1121 = vmatprep.mubr.bf16.mxu1 %v257_v42  ;;  %v1999_v36 = vld [vmem:[#allocation8 + $0x34c] ss:$16 sps:$4 sm:$0xff]   ;;  %v1994_v37 = vld [vmem:[#allocation8 + $0x148] ss:$16 sps:$4 sm:$0xff]  }
 0x111   :  { %1081 = vmatmul.mubr.bf16.vlgmr.msra.gmra.mxu0 %v2254_v45  ;;  %1122 = vmatmul.mubr.bf16.vlgmr.msra.gmra.mxu1 %v2252_v38  ;;  %v1997_v39 = vld [vmem:[#allocation8 + $0x348] ss:$16 sps:$4 sm:$0xff]   ;;  %v2002_v40 = vld [vmem:[#allocation8 + $0x12c] ss:$16 sps:$4 sm:$0xff]  }
 0x112   :  { %1131 = vmatpush1.bf16.msra.mxu0 %v1916_v43  ;;  %1172 = vmatpush1.bf16.msra.mxu1 %v1919_v44  ;;  %v2003_v43 = vld [vmem:[#allocation8 + $0x328] ss:$16 sps:$4 sm:$0xff]   ;;  %v2008_v44 = vld [vmem:[#allocation8 + $0x10c] ss:$16 sps:$4 sm:$0xff]  }
 0x113   :  { %1162 = vmatprep.mubr.bf16.mxu0 %v255_v41  ;;  %1203 = vmatprep.mubr.bf16.mxu1 %v257_v42  ;;  %v2005_v41 = vld [vmem:[#allocation8 + $0x32c] ss:$16 sps:$4 sm:$0xff]   ;;  %v2000_v42 = vld [vmem:[#allocation8 + $0x128] ss:$16 sps:$4 sm:$0xff]  }
 0x114   :  { %1132 = vmatprep.subr.bf16.mxu0 %v1924_v46  ;;  %1173 = vmatprep.subr.bf16.mxu1 %v1927_v47  ;;  %v2011_v46 = vld [vmem:[#allocation8 + $0x30c] ss:$16 sps:$4 sm:$0xff]   ;;  %v2006_v47 = vld [vmem:[#allocation8 + $0x108] ss:$16 sps:$4 sm:$0xff]  }
 0x116   :  { %1133 = vmatpush1.bf16.msra.mxu0 %v1922_v48  ;;  %1174 = vmatpush1.bf16.msra.mxu1 %v1925_v49  ;;  %v2009_v48 = vld [vmem:[#allocation8 + $0x308] ss:$16 sps:$4 sm:$0xff]  }
 0x117   :  { %1134 = vmatprep.subr.bf16.mxu0 %v1930_v50  ;;  %1175 = vmatprep.subr.bf16.mxu1 %v1933_v51  ;;  %v2012_v49 = vld [vmem:[#allocation10 + $0x78] sm:$0xff]   ;;  %v2014_v51 = vld [vmem:[#allocation10 + $0x70] sm:$0xff]  }
 0x118   :  { %v2013_v50 = vld [vmem:[#allocation10 + $0x38] sm:$0xff]  }
 0x11a   :  { %1135 = vmatpush1.bf16.msra.mxu0 %v1928_v52  ;;  %1176 = vmatpush1.bf16.msra.mxu1 %v1931_v53  ;;  %v2015_v52 = vld [vmem:[#allocation10 + $0x30] sm:$0xff]   ;;  %v2016_v53 = vld [vmem:[#allocation10 + $0x68] sm:$0xff]  }
 0x11b   :  { %1136 = vmatprep.subr.bf16.mxu0 %v1936_v54  ;;  %1177 = vmatprep.subr.bf16.mxu1 %v1939_v55  ;;  %v2017_v54 = vld [vmem:[#allocation10 + $0x28] sm:$0xff]   ;;  %v2018_v55 = vld [vmem:[#allocation10 + $0x60] sm:$0xff]  }
 0x11e   :  { %1137 = vmatpush1.bf16.msra.mxu0 %v1934_v56  ;;  %1178 = vmatpush1.bf16.msra.mxu1 %v1937_v57  ;;  %v2019_v56 = vld [vmem:[#allocation10 + $0x20] sm:$0xff]   ;;  %v2020_v57 = vld [vmem:[#allocation10 + $0x58] sm:$0xff]  }
 0x11f   :  { %1138 = vmatprep.subr.bf16.mxu0 %v1942_v58  ;;  %1179 = vmatprep.subr.bf16.mxu1 %v1945_v59  ;;  %v2028_v58 = vld [vmem:[#allocation10 + $0xf8] sm:$0xff]  }
 0x120   :  { %v2029_v59 = vld [vmem:[#allocation10 + $0xb8] sm:$0xff]  }
 0x122   :  { %1139 = vmatpush1.bf16.msra.mxu0 %v1940_v60  ;;  %1180 = vmatpush1.bf16.msra.mxu1 %v1943_v61  ;;  %v2030_v60 = vld [vmem:[#allocation10 + $0xf0] sm:$0xff]   ;;  %v2021_v61 = vld [vmem:[#allocation10 + $0x18] sm:$0xff]  }
 0x123   :  { %1140 = vmatprep.subr.bf16.mxu0 %v1948_v62  ;;  %1181 = vmatprep.subr.bf16.mxu1 %v1951_v63  ;;  %v2032_v62 = vld [vmem:[#allocation10 + $0xe8] sm:$0xff]   ;;  %v2023_v63 = vld [vmem:[#allocation10 + $0x10] sm:$0xff]  }
 0x126   :  { %1141 = vmatpush1.bf16.msra.mxu0 %v1946_v0  ;;  %1182 = vmatpush1.bf16.msra.mxu1 %v1949_v1  ;;  %v2024_v0 = vld [vmem:[#allocation10 + $0x48] sm:$0xff]  }
 0x127   :  { %1142 = vmatprep.subr.bf16.mxu0 %v1954_v2  ;;  %1183 = vmatprep.subr.bf16.mxu1 %v1957_v3  ;;  %v2033_v1 = vld [vmem:[#allocation10 + $0xa8] sm:$0xff]   ;;  %v2034_v2 = vld [vmem:[#allocation10 + $0xe0] sm:$0xff]  }
 0x128   :  { %v2025_v3 = vld [vmem:[#allocation10 + $0x8] sm:$0xff]  }
 0x12a   :  { %1143 = vmatpush1.bf16.msra.mxu0 %v1952_v4  ;;  %1184 = vmatpush1.bf16.msra.mxu1 %v1955_v5  ;;  %v2026_v4 = vld [vmem:[#allocation10 + $0x40] sm:$0xff]  }
 0x12b   :  { %1144 = vmatprep.subr.bf16.mxu0 %v1960_v6  ;;  %1185 = vmatprep.subr.bf16.mxu1 %v1963_v7  ;;  %v2035_v5 = vld [vmem:[#allocation10 + $0xa0] sm:$0xff]   ;;  %v2036_v6 = vld [vmem:[#allocation10 + $0xd8] sm:$0xff]  }
 0x12c   :  { %v2027_v7 = vld [vmem:[#allocation10] sm:$0xff]  }
 0x12e   :  { %1145 = vmatpush1.bf16.msra.mxu0 %v1958_v8  ;;  %1186 = vmatpush1.bf16.msra.mxu1 %v1961_v9  ;;  %v2037_v8 = vld [vmem:[#allocation10 + $0x98] sm:$0xff]   ;;  %v2038_v9 = vld [vmem:[#allocation10 + $0xd0] sm:$0xff]  }
 0x12f   :  { %1146 = vmatprep.subr.bf16.mxu0 %v1966_v10  ;;  %1187 = vmatprep.subr.bf16.mxu1 %v1969_v11  ;;  %v2039_v10 = vld [vmem:[#allocation10 + $0x90] sm:$0xff]   ;;  %v2040_v11 = vld [vmem:[#allocation10 + $0xc8] sm:$0xff]  }
 0x132   :  { %1147 = vmatpush2.bf16.msra.mxu0 %v1964_v12  ;;  %1188 = vmatpush2.bf16.msra.mxu1 %v1967_v13  ;;  %v2041_v12 = vld [vmem:[#allocation10 + $0x88] sm:$0xff]   ;;  %v2042_v13 = vld [vmem:[#allocation10 + $0xc0] sm:$0xff]  }
 0x133   :  { %1148 = vmatprep.subr.bf16.mxu0 %v1972_v17  ;;  %1189 = vmatprep.subr.bf16.mxu1 %v1975_v20  ;;  %v2043_v17 = vld [vmem:[#allocation10 + $0x80] sm:$0xff]   ;;  %v386_v20 = vld [vmem:[%s2281_s4] sm:$0xf] }
 0x136   :  { %1149 = vmatpush2.bf16.msra.mxu0 %v1970_v21  ;;  %1190 = vmatpush2.bf16.msra.mxu1 %v1973_v22  ;;  %v391_v21 = vrot.slane %v386_v20, %v106_v15  ;;  %v395_v22 = vrot.slane %v386_v20, %v110_v18  ;;  %v399_v15 = vrot.slane %v386_v20, %v114_v16 }
 0x137   :  { %1150 = vmatprep.subr.bf16.mxu0 %v1978_v23  ;;  %1191 = vmatprep.subr.bf16.mxu1 %v1981_v24  ;;  %v403_v18 = vrot.slane %v386_v20, %v118_v19 }
 0x13a   :  { %1151 = vmatpush2.bf16.msra.mxu0 %v1976_v25  ;;  %1192 = vmatpush2.bf16.msra.mxu1 %v1979_v26 }
 0x13b   :  { %1152 = vmatprep.subr.bf16.mxu0 %v1984_v27  ;;  %1193 = vmatprep.subr.bf16.mxu1 %v1987_v28 }
 0x13e   :  { %1153 = vmatpush2.bf16.msra.mxu0 %v1982_v29  ;;  %1194 = vmatpush2.bf16.msra.mxu1 %v1985_v30 }
 0x13f   :  { %1154 = vmatprep.subr.bf16.mxu0 %v1990_v31  ;;  %1195 = vmatprep.subr.bf16.mxu1 %v1993_v32 }
 0x142   :  { %1155 = vmatpush2.bf16.msra.mxu0 %v1988_v33  ;;  %1196 = vmatpush2.bf16.msra.mxu1 %v1991_v34 }
 0x143   :  { %1156 = vmatprep.subr.bf16.mxu0 %v1996_v35  ;;  %1197 = vmatprep.subr.bf16.mxu1 %v1999_v36 }
 0x146   :  { %1157 = vmatpush2.bf16.msra.mxu0 %v1994_v37  ;;  %1198 = vmatpush2.bf16.msra.mxu1 %v1997_v39 }
 0x147   :  { %1158 = vmatprep.subr.bf16.mxu0 %v2002_v40  ;;  %1199 = vmatprep.subr.bf16.mxu1 %v2005_v41 }
 0x14a   :  { %1159 = vmatpush2.bf16.msra.mxu0 %v2000_v42  ;;  %1200 = vmatpush2.bf16.msra.mxu1 %v2003_v43 }
 0x14b   :  { %1160 = vmatprep.subr.bf16.mxu0 %v2008_v44  ;;  %1201 = vmatprep.subr.bf16.mxu1 %v2011_v46 }
 0x14e   :  { %1161 = vmatpush2.bf16.msra.mxu0 %v2006_v47  ;;  %1202 = vmatpush2.bf16.msra.mxu1 %v2009_v48 }
 0x14f   :  { %1753 = vmatprep.subr.bf16.mxu0 %v2012_v49  ;;  %1775 = vmatprep.subr.bf16.mxu1 %v2028_v58 }
 0x151   :  { %1163 = vmatmul.mubr.bf16.vlgmr.msra.gmra.mxu0 %v2254_v45  ;;  %1204 = vmatmul.mubr.bf16.vlgmr.msra.gmra.mxu1 %v2252_v38  ;;  %v2022_v45 = vld [vmem:[#allocation10 + $0x50] sm:$0xff]  }
 0x152   :  { %1754 = vmatpush3.bf16.msra.mxu0 %v2013_v50  ;;  %1776 = vmatpush3.bf16.msra.mxu1 %v2029_v59  ;;  %v2031_v38 = vld [vmem:[#allocation10 + $0xb0] sm:$0xff]  }
 0x153   :  { %1755 = vmatprep.subr.bf16.mxu0 %v2014_v51  ;;  %1777 = vmatprep.subr.bf16.mxu1 %v2030_v60  ;;  %v1720_v59 = vld [vmem:[%s2283_s6] ss:$0 sm:$0xff] }
 0x156   :  { %1756 = vmatpush3.bf16.msra.mxu0 %v2015_v52  ;;  %1778 = vmatpush3.bf16.msra.mxu1 %v2031_v38 }
 0x157   :  { %1757 = vmatprep.subr.bf16.mxu0 %v2016_v53  ;;  %1779 = vmatprep.subr.bf16.mxu1 %v2032_v62 }
 0x15a   :  { %1758 = vmatpush3.bf16.msra.mxu0 %v2017_v54  ;;  %1780 = vmatpush3.bf16.msra.mxu1 %v2033_v1 }
 0x15b   :  { %1759 = vmatprep.subr.bf16.mxu0 %v2018_v55  ;;  %1781 = vmatprep.subr.bf16.mxu1 %v2034_v2 }
 0x15e   :  { %1760 = vmatpush3.bf16.msra.mxu0 %v2019_v56  ;;  %1782 = vmatpush3.bf16.msra.mxu1 %v2035_v5 }
 0x15f   :  { %1761 = vmatprep.subr.bf16.mxu0 %v2020_v57  ;;  %1783 = vmatprep.subr.bf16.mxu1 %v2036_v6 }
 0x162   :  { %1762 = vmatpush3.bf16.msra.mxu0 %v2021_v61  ;;  %1784 = vmatpush3.bf16.msra.mxu1 %v2037_v8 }
 0x163   :  { %1763 = vmatprep.subr.bf16.mxu0 %v2022_v45  ;;  %1785 = vmatprep.subr.bf16.mxu1 %v2038_v9 }
 0x166   :  { %1764 = vmatpush3.bf16.msra.mxu0 %v2023_v63  ;;  %1786 = vmatpush3.bf16.msra.mxu1 %v2039_v10 }
 0x167   :  { %1765 = vmatprep.subr.bf16.mxu0 %v2024_v0  ;;  %1787 = vmatprep.subr.bf16.mxu1 %v2040_v11 }
 0x16a   :  { %1766 = vmatpush3.bf16.msra.mxu0 %v2025_v3  ;;  %1788 = vmatpush3.bf16.msra.mxu1 %v2041_v12 }
 0x16b   :  { %1767 = vmatprep.subr.bf16.mxu0 %v2026_v4  ;;  %1789 = vmatprep.subr.bf16.mxu1 %v2042_v13 }
 0x16e   :  { %1768 = vmatpush3.bf16.msra.mxu0 %v2027_v7  ;;  %1790 = vmatpush3.bf16.msra.mxu1 %v2043_v17 }
 0x1d1   :  { %v1082_v23 = vpop.f32.mrf.mxu0  ;;  %v1123_v24 = vpop.f32.mrf.mxu1 }
 0x1d2   :  { %v1083_v25 = vadd.f32 %v1082_v23, %v391_v21 }
 0x1d3   :  { %v1084_v26 = vpop.f32.mrf.mxu0  ;;  %v1125_v27 = vpop.f32.mrf.mxu1 }
 0x1d4   :  { %v1124_v28 = vadd.f32 %v1123_v24, %v1083_v25  ;;  %v1085_v29 = vadd.f32 %v1084_v26, %v395_v22 }
 0x1d5   :  { %v1086_v30 = vpop.f32.mrf.mxu0  ;;  %v1127_v31 = vpop.f32.mrf.mxu1 }
 0x1d6   :  { %v1126_v32 = vadd.f32 %v1125_v27, %v1085_v29  ;;  %v1212_v33 = vmax.f32 %v1124_v28, 0.0 }
 0x1d7   :  { %v1087_v34 = vpop.f32.mrf.mxu0  ;;  %v1128_v35 = vpop.f32.mrf.mxu1 }
 0x1d8   :  { %v1213_v36 = vmax.f32 %v1126_v32, 0.0  ;;  %v1216_v39 = vpack.c.bf16 %v1212_v33, %v1212_v33 }
 0x1da   :  { %v1217_v37 = vpack.c.bf16 %v1213_v36, %v1213_v36 }
 0x1dc   :  { %1515 = vmatprep.mubr.bf16.mxu0 %v1217_v37 }
 0x1dd   :  { %1516 = vmatmul.mubr.bf16.vlgmr.msra.gmra.mxu0 %v1216_v39 }
 0x211   :  { %v1164_v40 = vpop.f32.mrf.mxu0  ;;  %v1205_v41 = vpop.f32.mrf.mxu1 }
 0x212   :  { %v1165_v42 = vadd.f32 %v1164_v40, %v399_v15 }
 0x213   :  { %v1166_v43 = vpop.f32.mrf.mxu0  ;;  %v1207_v44 = vpop.f32.mrf.mxu1 }
 0x214   :  { %v1206_v46 = vadd.f32 %v1205_v41, %v1165_v42  ;;  %v1167_v47 = vadd.f32 %v1166_v43, %v403_v18 }
 0x215   :  { %v1168_v48 = vpop.f32.mrf.mxu0  ;;  %v1209_v49 = vpop.f32.mrf.mxu1 }
 0x216   :  { %v1208_v50 = vadd.f32 %v1207_v44, %v1167_v47  ;;  %v1214_v51 = vmax.f32 %v1206_v46, 0.0 }
 0x217   :  { %v1169_v52 = vpop.f32.mrf.mxu0  ;;  %v1210_v53 = vpop.f32.mrf.mxu1 }
 0x218   :  { %v1215_v54 = vmax.f32 %v1208_v50, 0.0  ;;  %v1218_v56 = vpack.c.bf16 %v1214_v51, %v1214_v51 }
 0x21a   :  { %v1219_v55 = vpack.c.bf16 %v1215_v54, %v1215_v54 }
 0x21c   :  { %1555 = vmatprep.mubr.bf16.mxu1 %v1219_v55 }
 0x21d   :  { %1556 = vmatmul.mubr.bf16.vlgmr.msra.gmra.mxu1 %v1218_v56 }
 0x29d   :  { %v1769_v14 = vpop.f32.mrf.mxu0 }
 0x29f   :  { %v1770_v16 = vpop.f32.mrf.mxu0 }
 0x2a0   :  { %v1771_v58 = vadd.f32 %v1770_v16, %v1769_v14 }
 0x2a1   :  { %v1772_v19 = vpop.f32.mrf.mxu0 }
 0x2a2   :  { %v1518_v45 = vadd.f32 %v1771_v58, %v1720_v59 }
 0x2a3   :  { %v1773_v57 = vpop.f32.mrf.mxu0 }
 0x2dd   :  { %v1791_v60 = vpop.f32.mrf.mxu1 }
 0x2df   :  { %v1792_v61 = vpop.f32.mrf.mxu1 }
 0x2e0   :  { %v1793_v38 = vadd.f32 %v1792_v61, %v1791_v60 }
 0x2e1   :  { %v1794_v62 = vpop.f32.mrf.mxu1 }
 0x2e2   :  { %v1558_v63 = vadd.f32 %v1793_v38, %v1518_v45 }
 0x2e3   :  { %v1795_v0 = vpop.f32.mrf.mxu1 }
 0x2e4   :  { %v1563_v1 = vpack.c.bf16 %v1558_v63, %v1558_v63 }
 0x2e6   :  { %1564 = vst [vmem:[#allocation11] sm:$0xf] %v1563_v1 }
 0x2e7   :  { %2155 = shalt.err (!%p2152_p1)
}
 0x2e8   :  { %1574 = dma.vmem_to_hbm [thread:$0]  %s1572_s29, 64, %s2284_s7, [#allocation4]  }
 0x2e9   :  { %2170 = dma.done.wait [#allocation4], 64  }
 0x2ea   :  { %2171 = vsyncadd [#allocation4], 4294967232 }
 0x2eb   :  { %1578 = vsyncpa [#allocation3], 1 }
 0x2ec   :  { %1579 = vsyncpa [#allocation6], 1 }
 0x2ed   :  { %1580 = vsyncpa [#allocation9], 1 }
 0x2ee   :  { %1581 = vsyncpa [#allocation4], 1 }

</bundles_post_ra>
